<compile_context>
chip_gen: v5e
topology: v5e:2x2
jax: 0.10.0
libtpu: 0.0.40
codegen_flags: <defaults>
</compile_context>

<pallas_src>
import functools

import jax
import jax.numpy as jnp
from jax.experimental import pallas as pl
from jax.experimental.pallas import tpu as pltpu


def _round_up(x, m):
    return ((x + m - 1) // m) * m


def _event_count_kernel(ev_ref, out_ref, acc_ref, *, tile_v, n_ev_tiles, rows):
    """ev_ref: (rows, 128) int32 voxel indices (-1 = padding/no-op).

    out_ref: (1, tile_v) output dtype; acc_ref: (rows, tile_v) int32 scratch.
    """
    vi = pl.program_id(0)          # voxel-tile index ("parallel")
    ei = pl.program_id(1)          # event-tile index ("arbitrary" reduction)

    @pl.when(ei == 0)
    def _():
        acc_ref[...] = jnp.zeros_like(acc_ref)

    ev = ev_ref[...]                                            # (rows, 128)

    # Voxel ids covered by this output tile: small (rows, tile_v) iota — a
    # handful of vregs, NOT a tile_n-sized broadcast.
    vox_ids = vi * tile_v + jax.lax.broadcasted_iota(
        jnp.int32, (rows, tile_v), 1)

    # Statically-unrolled scatter-as-compare over the 128 event lanes.  Each
    # iteration broadcasts `rows` events (one lane column) across the voxel
    # lanes, compares, and ORs into the running register value — the full
    # [tile_n, tile_v] match intermediate never materializes.
    hit = ev[:, 0:1] == vox_ids                                 # (rows, tile_v)
    for l in range(1, 128):
        hit = jnp.logical_or(hit, ev[:, l:l + 1] == vox_ids)

    # Single int32 OR into the resident accumulator per event step.
    acc_ref[...] = acc_ref[...] | hit.astype(jnp.int32)

    # One cross-sublane (XLU) reduce + dtype convert per voxel tile.
    @pl.when(ei == n_ev_tiles - 1)
    def _():
        out_ref[...] = jnp.max(acc_ref[...], axis=0,
                               keepdims=True).astype(out_ref.dtype)


def quantization_layer_event_count(events, dim, *, tile_n=None, tile_v=None):
    """Pallas equivalent of QuantizationLayerEventCount(dim).forward(events)."""
    H, W = dim
    V = 2 * H * W
    N = int(events.shape[0])
    dtype = events.dtype

    # ---- host-side (XLA) preprocessing: one fused elementwise pass ---------
    # t (events[:, 2]) is normalized in the torch module but never affects the
    # output, so it is dropped.  The float index is truncated as a whole
    # (matching torch's idx.long()), not per-column.
    x = events[:, 0]
    y = events[:, 1]
    p = events[:, 3]
    idx = (x + W * y + (W * H) * ((p + 1.0) * 0.5)).astype(jnp.int32)   # [N]

    # ---- voxel tiling -------------------------------------------------------
    V_pad0 = _round_up(V, 128)
    if tile_v is None:
        tile_v = min(V_pad0, 2048)
        if tile_v >= V_pad0 and V_pad0 >= 256:
            # Guarantee >= 2 voxel tiles so the "parallel" axis can be
            # megacore-split on v7x (near-free on single-TC v5e/v6e).
            tile_v = _round_up(-(-V_pad0 // 2), 128)
    tile_v = max(128, _round_up(int(tile_v), 128))
    V_pad = _round_up(V, tile_v)
    n_v_tiles = V_pad // tile_v

    # ---- event tiling -------------------------------------------------------
    # Single step for small N; 1024-2048 events/step for large N so the
    # ~0.35us/step overhead is amortized.  rows*tile_v is kept <= 16K elements
    # so the register working set (hit + vox_ids) stays well inside 64 vregs.
    if tile_n is None:
        if N <= 1024:
            tile_n = _round_up(max(N, 1), 128)
        else:
            tile_n = 2048 if tile_v <= 1024 else 1024
    tile_n = max(128, _round_up(int(tile_n), 128))
    if tile_n < N:
        # Multi-tile event blocks need a sublane count that is a multiple of 8.
        tile_n = _round_up(tile_n, 1024)
    rows = tile_n // 128
    n_ev_tiles = max(1, (N + tile_n - 1) // tile_n)

    # Pad the tail with -1 (never matches a voxel id >= 0) and reshape to a
    # lane-dense (n_ev_tiles*rows, 128) layout; event order is irrelevant.
    total = n_ev_tiles * tile_n
    idx_padded = jnp.pad(idx, (0, total - N), constant_values=-1)
    ev2d = idx_padded.reshape(n_ev_tiles * rows, 128)

    kernel = functools.partial(
        _event_count_kernel, tile_v=tile_v, n_ev_tiles=n_ev_tiles, rows=rows)

    vox = pl.pallas_call(
        kernel,
        out_shape=jax.ShapeDtypeStruct((1, V_pad), dtype),
        grid_spec=pltpu.PrefetchScalarGridSpec(
            num_scalar_prefetch=0,
            grid=(n_v_tiles, n_ev_tiles),
            in_specs=[pl.BlockSpec((rows, 128), lambda v, i: (i, 0))],
            out_specs=pl.BlockSpec((1, tile_v), lambda v, i: (0, v)),
            scratch_shapes=[pltpu.VMEM((rows, tile_v), jnp.int32)],
        ),
        compiler_params=pltpu.CompilerParams(
            # Voxel tiles are independent (megacore split on v7x); the event
            # axis accumulates into scratch and must stay sequential.
            dimension_semantics=("parallel", "arbitrary"),
        ),
    )(ev2d)

    # B = 1 in the reference module; strip voxel padding (events whose idx
    # lands in [V, V_pad) are harmlessly written there and sliced off here).
    return vox[:, :V].reshape(-1, 2, H, W)


def _reference(events, dim):
    """Pure-JAX reference mirroring the PyTorch forward."""
    H, W = dim
    V = 2 * H * W
    x, y, t, p = events.T
    p_bin = (p + 1.0) / 2.0
    idx = (x + W * y + W * H * p_bin).astype(jnp.int32)
    counts = jnp.zeros((V,), dtype=events.dtype).at[idx].add(1.0)
    vox = jnp.where(counts > 0, 1.0, 0.0).astype(events.dtype)
    return vox.reshape(-1, 2, H, W)


if __name__ == "__main__":
    key = jax.random.PRNGKey(0)
    H, W = 16, 16
    N = 200  # number of events

    kx, ky, kt, kp = jax.random.split(key, 4)
    x = jax.random.randint(kx, (N,), 0, W).astype(jnp.float32)
    y = jax.random.randint(ky, (N,), 0, H).astype(jnp.float32)
    t = jax.random.uniform(kt, (N,), minval=0.1, maxval=1.0).astype(jnp.float32)
    p = (jax.random.randint(kp, (N,), 0, 2) * 2 - 1).astype(jnp.float32)  # {-1,+1}
    events = jnp.stack([x, y, t, p], axis=1)  # [N, 4]

    out = quantization_layer_event_count(events, (H, W))
    out = jax.block_until_ready(out)

    ref = _reference(events, (H, W))
    assert out.shape == (1, 2, H, W), out.shape
    assert jnp.allclose(out, ref), "mismatch vs reference"

    print("KERNEL_OK")
</pallas_src>

<mosaic_0001>
module attributes {stable_mosaic.version = 11 : i64} {
  func.func @_event_count_kernel(%arg0: i32, %arg1: i32, %arg2: memref<2x128xi32, #tpu.memory_space<vmem>>, %arg3: memref<1x256xf32, #tpu.memory_space<vmem>>, %arg4: memref<2x256xi32, #tpu.memory_space<vmem>>) attributes {dimension_semantics = [#tpu.dimension_semantics<parallel>, #tpu.dimension_semantics<arbitrary>], iteration_bounds = array<i64: 2, 1>, scalar_prefetch = 0 : i64, scratch_operands = 1 : i64, tpu.core_type = #tpu.core_type<tc>, window_params = [{transform_indices = @transform_0, window_bounds = array<i64: 2, 128>}, {transform_indices = @transform_1, window_bounds = array<i64: 1, 256>}]} {
    %c0_i32 = arith.constant 0 : i32
    %0 = arith.cmpi eq, %arg1, %c0_i32 : i32
    %1 = arith.extui %0 : i1 to i32
    %c0_i32_0 = arith.constant 0 : i32
    %2 = arith.cmpi ne, %1, %c0_i32_0 : i32
    scf.if %2 {
      %c0_i32_8 = arith.constant 0 : i32
      %526 = vector.broadcast %c0_i32_8 : i32 to vector<2x256xi32>
      %c0_9 = arith.constant 0 : index
      %c0_10 = arith.constant 0 : index
      %527 = vector.load %arg4[%c0_9, %c0_10] : memref<2x256xi32, #tpu.memory_space<vmem>>, vector<2x256xi32>
      tpu.vector_store %arg4[%c0_9, %c0_10], %526 {strides = array<i32>} : memref<2x256xi32, #tpu.memory_space<vmem>>, vector<2x256xi32>,
    } else {
    }
    %c0 = arith.constant 0 : index
    %c0_1 = arith.constant 0 : index
    %3 = vector.load %arg2[%c0, %c0_1] : memref<2x128xi32, #tpu.memory_space<vmem>>, vector<2x128xi32>
    %c256_i32 = arith.constant 256 : i32
    %4 = arith.muli %arg0, %c256_i32 : i32
    %5 = tpu.iota {dimensions = array<i32: 1>} : vector<2x256xi32>
    %6 = vector.broadcast %4 : i32 to vector<2x256xi32>
    %7 = arith.addi %6, %5 : vector<2x256xi32>
    %8 = vector.extract_strided_slice %3 {offsets = [0, 0], sizes = [2, 1], strides = [1, 1]} : vector<2x128xi32> to vector<2x1xi32>
    %9 = vector.broadcast %8 : vector<2x1xi32> to vector<2x256xi32>
    %10 = arith.cmpi eq, %9, %7 : vector<2x256xi32>
    %11 = vector.extract_strided_slice %3 {offsets = [0, 1], sizes = [2, 1], strides = [1, 1]} : vector<2x128xi32> to vector<2x1xi32>
    %12 = vector.broadcast %11 : vector<2x1xi32> to vector<2x256xi32>
    %13 = arith.cmpi eq, %12, %7 : vector<2x256xi32>
    %14 = arith.ori %10, %13 : vector<2x256xi1>
    %15 = vector.extract_strided_slice %3 {offsets = [0, 2], sizes = [2, 1], strides = [1, 1]} : vector<2x128xi32> to vector<2x1xi32>
    %16 = vector.broadcast %15 : vector<2x1xi32> to vector<2x256xi32>
    %17 = arith.cmpi eq, %16, %7 : vector<2x256xi32>
    %18 = arith.ori %14, %17 : vector<2x256xi1>
    %19 = vector.extract_strided_slice %3 {offsets = [0, 3], sizes = [2, 1], strides = [1, 1]} : vector<2x128xi32> to vector<2x1xi32>
    %20 = vector.broadcast %19 : vector<2x1xi32> to vector<2x256xi32>
    %21 = arith.cmpi eq, %20, %7 : vector<2x256xi32>
    %22 = arith.ori %18, %21 : vector<2x256xi1>
    %23 = vector.extract_strided_slice %3 {offsets = [0, 4], sizes = [2, 1], strides = [1, 1]} : vector<2x128xi32> to vector<2x1xi32>
    %24 = vector.broadcast %23 : vector<2x1xi32> to vector<2x256xi32>
    %25 = arith.cmpi eq, %24, %7 : vector<2x256xi32>
    %26 = arith.ori %22, %25 : vector<2x256xi1>
    %27 = vector.extract_strided_slice %3 {offsets = [0, 5], sizes = [2, 1], strides = [1, 1]} : vector<2x128xi32> to vector<2x1xi32>
    %28 = vector.broadcast %27 : vector<2x1xi32> to vector<2x256xi32>
    %29 = arith.cmpi eq, %28, %7 : vector<2x256xi32>
    %30 = arith.ori %26, %29 : vector<2x256xi1>
    %31 = vector.extract_strided_slice %3 {offsets = [0, 6], sizes = [2, 1], strides = [1, 1]} : vector<2x128xi32> to vector<2x1xi32>
    %32 = vector.broadcast %31 : vector<2x1xi32> to vector<2x256xi32>
    %33 = arith.cmpi eq, %32, %7 : vector<2x256xi32>
    %34 = arith.ori %30, %33 : vector<2x256xi1>
    %35 = vector.extract_strided_slice %3 {offsets = [0, 7], sizes = [2, 1], strides = [1, 1]} : vector<2x128xi32> to vector<2x1xi32>
    %36 = vector.broadcast %35 : vector<2x1xi32> to vector<2x256xi32>
    %37 = arith.cmpi eq, %36, %7 : vector<2x256xi32>
    %38 = arith.ori %34, %37 : vector<2x256xi1>
    %39 = vector.extract_strided_slice %3 {offsets = [0, 8], sizes = [2, 1], strides = [1, 1]} : vector<2x128xi32> to vector<2x1xi32>
    %40 = vector.broadcast %39 : vector<2x1xi32> to vector<2x256xi32>
    %41 = arith.cmpi eq, %40, %7 : vector<2x256xi32>
    %42 = arith.ori %38, %41 : vector<2x256xi1>
    %43 = vector.extract_strided_slice %3 {offsets = [0, 9], sizes = [2, 1], strides = [1, 1]} : vector<2x128xi32> to vector<2x1xi32>
    %44 = vector.broadcast %43 : vector<2x1xi32> to vector<2x256xi32>
    %45 = arith.cmpi eq, %44, %7 : vector<2x256xi32>
    %46 = arith.ori %42, %45 : vector<2x256xi1>
    %47 = vector.extract_strided_slice %3 {offsets = [0, 10], sizes = [2, 1], strides = [1, 1]} : vector<2x128xi32> to vector<2x1xi32>
    %48 = vector.broadcast %47 : vector<2x1xi32> to vector<2x256xi32>
    %49 = arith.cmpi eq, %48, %7 : vector<2x256xi32>
    %50 = arith.ori %46, %49 : vector<2x256xi1>
    %51 = vector.extract_strided_slice %3 {offsets = [0, 11], sizes = [2, 1], strides = [1, 1]} : vector<2x128xi32> to vector<2x1xi32>
    %52 = vector.broadcast %51 : vector<2x1xi32> to vector<2x256xi32>
    %53 = arith.cmpi eq, %52, %7 : vector<2x256xi32>
    %54 = arith.ori %50, %53 : vector<2x256xi1>
    %55 = vector.extract_strided_slice %3 {offsets = [0, 12], sizes = [2, 1], strides = [1, 1]} : vector<2x128xi32> to vector<2x1xi32>
    %56 = vector.broadcast %55 : vector<2x1xi32> to vector<2x256xi32>
    %57 = arith.cmpi eq, %56, %7 : vector<2x256xi32>
    %58 = arith.ori %54, %57 : vector<2x256xi1>
    %59 = vector.extract_strided_slice %3 {offsets = [0, 13], sizes = [2, 1], strides = [1, 1]} : vector<2x128xi32> to vector<2x1xi32>
    %60 = vector.broadcast %59 : vector<2x1xi32> to vector<2x256xi32>
    %61 = arith.cmpi eq, %60, %7 : vector<2x256xi32>
    %62 = arith.ori %58, %61 : vector<2x256xi1>
    %63 = vector.extract_strided_slice %3 {offsets = [0, 14], sizes = [2, 1], strides = [1, 1]} : vector<2x128xi32> to vector<2x1xi32>
    %64 = vector.broadcast %63 : vector<2x1xi32> to vector<2x256xi32>
    %65 = arith.cmpi eq, %64, %7 : vector<2x256xi32>
    %66 = arith.ori %62, %65 : vector<2x256xi1>
    %67 = vector.extract_strided_slice %3 {offsets = [0, 15], sizes = [2, 1], strides = [1, 1]} : vector<2x128xi32> to vector<2x1xi32>
    %68 = vector.broadcast %67 : vector<2x1xi32> to vector<2x256xi32>
    %69 = arith.cmpi eq, %68, %7 : vector<2x256xi32>
    %70 = arith.ori %66, %69 : vector<2x256xi1>
    %71 = vector.extract_strided_slice %3 {offsets = [0, 16], sizes = [2, 1], strides = [1, 1]} : vector<2x128xi32> to vector<2x1xi32>
    %72 = vector.broadcast %71 : vector<2x1xi32> to vector<2x256xi32>
    %73 = arith.cmpi eq, %72, %7 : vector<2x256xi32>
    %74 = arith.ori %70, %73 : vector<2x256xi1>
    %75 = vector.extract_strided_slice %3 {offsets = [0, 17], sizes = [2, 1], strides = [1, 1]} : vector<2x128xi32> to vector<2x1xi32>
    %76 = vector.broadcast %75 : vector<2x1xi32> to vector<2x256xi32>
    %77 = arith.cmpi eq, %76, %7 : vector<2x256xi32>
    %78 = arith.ori %74, %77 : vector<2x256xi1>
    %79 = vector.extract_strided_slice %3 {offsets = [0, 18], sizes = [2, 1], strides = [1, 1]} : vector<2x128xi32> to vector<2x1xi32>
    %80 = vector.broadcast %79 : vector<2x1xi32> to vector<2x256xi32>
    %81 = arith.cmpi eq, %80, %7 : vector<2x256xi32>
    %82 = arith.ori %78, %81 : vector<2x256xi1>
    %83 = vector.extract_strided_slice %3 {offsets = [0, 19], sizes = [2, 1], strides = [1, 1]} : vector<2x128xi32> to vector<2x1xi32>
    %84 = vector.broadcast %83 : vector<2x1xi32> to vector<2x256xi32>
    %85 = arith.cmpi eq, %84, %7 : vector<2x256xi32>
    %86 = arith.ori %82, %85 : vector<2x256xi1>
    %87 = vector.extract_strided_slice %3 {offsets = [0, 20], sizes = [2, 1], strides = [1, 1]} : vector<2x128xi32> to vector<2x1xi32>
    %88 = vector.broadcast %87 : vector<2x1xi32> to vector<2x256xi32>
    %89 = arith.cmpi eq, %88, %7 : vector<2x256xi32>
    %90 = arith.ori %86, %89 : vector<2x256xi1>
    %91 = vector.extract_strided_slice %3 {offsets = [0, 21], sizes = [2, 1], strides = [1, 1]} : vector<2x128xi32> to vector<2x1xi32>
    %92 = vector.broadcast %91 : vector<2x1xi32> to vector<2x256xi32>
    %93 = arith.cmpi eq, %92, %7 : vector<2x256xi32>
    %94 = arith.ori %90, %93 : vector<2x256xi1>
    %95 = vector.extract_strided_slice %3 {offsets = [0, 22], sizes = [2, 1], strides = [1, 1]} : vector<2x128xi32> to vector<2x1xi32>
    %96 = vector.broadcast %95 : vector<2x1xi32> to vector<2x256xi32>
    %97 = arith.cmpi eq, %96, %7 : vector<2x256xi32>
    %98 = arith.ori %94, %97 : vector<2x256xi1>
    %99 = vector.extract_strided_slice %3 {offsets = [0, 23], sizes = [2, 1], strides = [1, 1]} : vector<2x128xi32> to vector<2x1xi32>
    %100 = vector.broadcast %99 : vector<2x1xi32> to vector<2x256xi32>
    %101 = arith.cmpi eq, %100, %7 : vector<2x256xi32>
    %102 = arith.ori %98, %101 : vector<2x256xi1>
    %103 = vector.extract_strided_slice %3 {offsets = [0, 24], sizes = [2, 1], strides = [1, 1]} : vector<2x128xi32> to vector<2x1xi32>
    %104 = vector.broadcast %103 : vector<2x1xi32> to vector<2x256xi32>
    %105 = arith.cmpi eq, %104, %7 : vector<2x256xi32>
    %106 = arith.ori %102, %105 : vector<2x256xi1>
    %107 = vector.extract_strided_slice %3 {offsets = [0, 25], sizes = [2, 1], strides = [1, 1]} : vector<2x128xi32> to vector<2x1xi32>
    %108 = vector.broadcast %107 : vector<2x1xi32> to vector<2x256xi32>
    %109 = arith.cmpi eq, %108, %7 : vector<2x256xi32>
    %110 = arith.ori %106, %109 : vector<2x256xi1>
    %111 = vector.extract_strided_slice %3 {offsets = [0, 26], sizes = [2, 1], strides = [1, 1]} : vector<2x128xi32> to vector<2x1xi32>
    %112 = vector.broadcast %111 : vector<2x1xi32> to vector<2x256xi32>
    %113 = arith.cmpi eq, %112, %7 : vector<2x256xi32>
    %114 = arith.ori %110, %113 : vector<2x256xi1>
    %115 = vector.extract_strided_slice %3 {offsets = [0, 27], sizes = [2, 1], strides = [1, 1]} : vector<2x128xi32> to vector<2x1xi32>
    %116 = vector.broadcast %115 : vector<2x1xi32> to vector<2x256xi32>
    %117 = arith.cmpi eq, %116, %7 : vector<2x256xi32>
    %118 = arith.ori %114, %117 : vector<2x256xi1>
    %119 = vector.extract_strided_slice %3 {offsets = [0, 28], sizes = [2, 1], strides = [1, 1]} : vector<2x128xi32> to vector<2x1xi32>
    %120 = vector.broadcast %119 : vector<2x1xi32> to vector<2x256xi32>
    %121 = arith.cmpi eq, %120, %7 : vector<2x256xi32>
    %122 = arith.ori %118, %121 : vector<2x256xi1>
    %123 = vector.extract_strided_slice %3 {offsets = [0, 29], sizes = [2, 1], strides = [1, 1]} : vector<2x128xi32> to vector<2x1xi32>
    %124 = vector.broadcast %123 : vector<2x1xi32> to vector<2x256xi32>
    %125 = arith.cmpi eq, %124, %7 : vector<2x256xi32>
    %126 = arith.ori %122, %125 : vector<2x256xi1>
    %127 = vector.extract_strided_slice %3 {offsets = [0, 30], sizes = [2, 1], strides = [1, 1]} : vector<2x128xi32> to vector<2x1xi32>
    %128 = vector.broadcast %127 : vector<2x1xi32> to vector<2x256xi32>
    %129 = arith.cmpi eq, %128, %7 : vector<2x256xi32>
    %130 = arith.ori %126, %129 : vector<2x256xi1>
    %131 = vector.extract_strided_slice %3 {offsets = [0, 31], sizes = [2, 1], strides = [1, 1]} : vector<2x128xi32> to vector<2x1xi32>
    %132 = vector.broadcast %131 : vector<2x1xi32> to vector<2x256xi32>
    %133 = arith.cmpi eq, %132, %7 : vector<2x256xi32>
    %134 = arith.ori %130, %133 : vector<2x256xi1>
    %135 = vector.extract_strided_slice %3 {offsets = [0, 32], sizes = [2, 1], strides = [1, 1]} : vector<2x128xi32> to vector<2x1xi32>
    %136 = vector.broadcast %135 : vector<2x1xi32> to vector<2x256xi32>
    %137 = arith.cmpi eq, %136, %7 : vector<2x256xi32>
    %138 = arith.ori %134, %137 : vector<2x256xi1>
    %139 = vector.extract_strided_slice %3 {offsets = [0, 33], sizes = [2, 1], strides = [1, 1]} : vector<2x128xi32> to vector<2x1xi32>
    %140 = vector.broadcast %139 : vector<2x1xi32> to vector<2x256xi32>
    %141 = arith.cmpi eq, %140, %7 : vector<2x256xi32>
    %142 = arith.ori %138, %141 : vector<2x256xi1>
    %143 = vector.extract_strided_slice %3 {offsets = [0, 34], sizes = [2, 1], strides = [1, 1]} : vector<2x128xi32> to vector<2x1xi32>
    %144 = vector.broadcast %143 : vector<2x1xi32> to vector<2x256xi32>
    %145 = arith.cmpi eq, %144, %7 : vector<2x256xi32>
    %146 = arith.ori %142, %145 : vector<2x256xi1>
    %147 = vector.extract_strided_slice %3 {offsets = [0, 35], sizes = [2, 1], strides = [1, 1]} : vector<2x128xi32> to vector<2x1xi32>
    %148 = vector.broadcast %147 : vector<2x1xi32> to vector<2x256xi32>
    %149 = arith.cmpi eq, %148, %7 : vector<2x256xi32>
    %150 = arith.ori %146, %149 : vector<2x256xi1>
    %151 = vector.extract_strided_slice %3 {offsets = [0, 36], sizes = [2, 1], strides = [1, 1]} : vector<2x128xi32> to vector<2x1xi32>
    %152 = vector.broadcast %151 : vector<2x1xi32> to vector<2x256xi32>
    %153 = arith.cmpi eq, %152, %7 : vector<2x256xi32>
    %154 = arith.ori %150, %153 : vector<2x256xi1>
    %155 = vector.extract_strided_slice %3 {offsets = [0, 37], sizes = [2, 1], strides = [1, 1]} : vector<2x128xi32> to vector<2x1xi32>
    %156 = vector.broadcast %155 : vector<2x1xi32> to vector<2x256xi32>
    %157 = arith.cmpi eq, %156, %7 : vector<2x256xi32>
    %158 = arith.ori %154, %157 : vector<2x256xi1>
    %159 = vector.extract_strided_slice %3 {offsets = [0, 38], sizes = [2, 1], strides = [1, 1]} : vector<2x128xi32> to vector<2x1xi32>
    %160 = vector.broadcast %159 : vector<2x1xi32> to vector<2x256xi32>
    %161 = arith.cmpi eq, %160, %7 : vector<2x256xi32>
    %162 = arith.ori %158, %161 : vector<2x256xi1>
    %163 = vector.extract_strided_slice %3 {offsets = [0, 39], sizes = [2, 1], strides = [1, 1]} : vector<2x128xi32> to vector<2x1xi32>
    %164 = vector.broadcast %163 : vector<2x1xi32> to vector<2x256xi32>
    %165 = arith.cmpi eq, %164, %7 : vector<2x256xi32>
    %166 = arith.ori %162, %165 : vector<2x256xi1>
    %167 = vector.extract_strided_slice %3 {offsets = [0, 40], sizes = [2, 1], strides = [1, 1]} : vector<2x128xi32> to vector<2x1xi32>
    %168 = vector.broadcast %167 : vector<2x1xi32> to vector<2x256xi32>
    %169 = arith.cmpi eq, %168, %7 : vector<2x256xi32>
    %170 = arith.ori %166, %169 : vector<2x256xi1>
    %171 = vector.extract_strided_slice %3 {offsets = [0, 41], sizes = [2, 1], strides = [1, 1]} : vector<2x128xi32> to vector<2x1xi32>
    %172 = vector.broadcast %171 : vector<2x1xi32> to vector<2x256xi32>
    %173 = arith.cmpi eq, %172, %7 : vector<2x256xi32>
    %174 = arith.ori %170, %173 : vector<2x256xi1>
    %175 = vector.extract_strided_slice %3 {offsets = [0, 42], sizes = [2, 1], strides = [1, 1]} : vector<2x128xi32> to vector<2x1xi32>
    %176 = vector.broadcast %175 : vector<2x1xi32> to vector<2x256xi32>
    %177 = arith.cmpi eq, %176, %7 : vector<2x256xi32>
    %178 = arith.ori %174, %177 : vector<2x256xi1>
    %179 = vector.extract_strided_slice %3 {offsets = [0, 43], sizes = [2, 1], strides = [1, 1]} : vector<2x128xi32> to vector<2x1xi32>
    %180 = vector.broadcast %179 : vector<2x1xi32> to vector<2x256xi32>
    %181 = arith.cmpi eq, %180, %7 : vector<2x256xi32>
    %182 = arith.ori %178, %181 : vector<2x256xi1>
    %183 = vector.extract_strided_slice %3 {offsets = [0, 44], sizes = [2, 1], strides = [1, 1]} : vector<2x128xi32> to vector<2x1xi32>
    %184 = vector.broadcast %183 : vector<2x1xi32> to vector<2x256xi32>
    %185 = arith.cmpi eq, %184, %7 : vector<2x256xi32>
    %186 = arith.ori %182, %185 : vector<2x256xi1>
    %187 = vector.extract_strided_slice %3 {offsets = [0, 45], sizes = [2, 1], strides = [1, 1]} : vector<2x128xi32> to vector<2x1xi32>
    %188 = vector.broadcast %187 : vector<2x1xi32> to vector<2x256xi32>
    %189 = arith.cmpi eq, %188, %7 : vector<2x256xi32>
    %190 = arith.ori %186, %189 : vector<2x256xi1>
    %191 = vector.extract_strided_slice %3 {offsets = [0, 46], sizes = [2, 1], strides = [1, 1]} : vector<2x128xi32> to vector<2x1xi32>
    %192 = vector.broadcast %191 : vector<2x1xi32> to vector<2x256xi32>
    %193 = arith.cmpi eq, %192, %7 : vector<2x256xi32>
    %194 = arith.ori %190, %193 : vector<2x256xi1>
    %195 = vector.extract_strided_slice %3 {offsets = [0, 47], sizes = [2, 1], strides = [1, 1]} : vector<2x128xi32> to vector<2x1xi32>
    %196 = vector.broadcast %195 : vector<2x1xi32> to vector<2x256xi32>
    %197 = arith.cmpi eq, %196, %7 : vector<2x256xi32>
    %198 = arith.ori %194, %197 : vector<2x256xi1>
    %199 = vector.extract_strided_slice %3 {offsets = [0, 48], sizes = [2, 1], strides = [1, 1]} : vector<2x128xi32> to vector<2x1xi32>
    %200 = vector.broadcast %199 : vector<2x1xi32> to vector<2x256xi32>
    %201 = arith.cmpi eq, %200, %7 : vector<2x256xi32>
    %202 = arith.ori %198, %201 : vector<2x256xi1>
    %203 = vector.extract_strided_slice %3 {offsets = [0, 49], sizes = [2, 1], strides = [1, 1]} : vector<2x128xi32> to vector<2x1xi32>
    %204 = vector.broadcast %203 : vector<2x1xi32> to vector<2x256xi32>
    %205 = arith.cmpi eq, %204, %7 : vector<2x256xi32>
    %206 = arith.ori %202, %205 : vector<2x256xi1>
    %207 = vector.extract_strided_slice %3 {offsets = [0, 50], sizes = [2, 1], strides = [1, 1]} : vector<2x128xi32> to vector<2x1xi32>
    %208 = vector.broadcast %207 : vector<2x1xi32> to vector<2x256xi32>
    %209 = arith.cmpi eq, %208, %7 : vector<2x256xi32>
    %210 = arith.ori %206, %209 : vector<2x256xi1>
    %211 = vector.extract_strided_slice %3 {offsets = [0, 51], sizes = [2, 1], strides = [1, 1]} : vector<2x128xi32> to vector<2x1xi32>
    %212 = vector.broadcast %211 : vector<2x1xi32> to vector<2x256xi32>
    %213 = arith.cmpi eq, %212, %7 : vector<2x256xi32>
    %214 = arith.ori %210, %213 : vector<2x256xi1>
    %215 = vector.extract_strided_slice %3 {offsets = [0, 52], sizes = [2, 1], strides = [1, 1]} : vector<2x128xi32> to vector<2x1xi32>
    %216 = vector.broadcast %215 : vector<2x1xi32> to vector<2x256xi32>
    %217 = arith.cmpi eq, %216, %7 : vector<2x256xi32>
    %218 = arith.ori %214, %217 : vector<2x256xi1>
    %219 = vector.extract_strided_slice %3 {offsets = [0, 53], sizes = [2, 1], strides = [1, 1]} : vector<2x128xi32> to vector<2x1xi32>
    %220 = vector.broadcast %219 : vector<2x1xi32> to vector<2x256xi32>
    %221 = arith.cmpi eq, %220, %7 : vector<2x256xi32>
    %222 = arith.ori %218, %221 : vector<2x256xi1>
    %223 = vector.extract_strided_slice %3 {offsets = [0, 54], sizes = [2, 1], strides = [1, 1]} : vector<2x128xi32> to vector<2x1xi32>
    %224 = vector.broadcast %223 : vector<2x1xi32> to vector<2x256xi32>
    %225 = arith.cmpi eq, %224, %7 : vector<2x256xi32>
    %226 = arith.ori %222, %225 : vector<2x256xi1>
    %227 = vector.extract_strided_slice %3 {offsets = [0, 55], sizes = [2, 1], strides = [1, 1]} : vector<2x128xi32> to vector<2x1xi32>
    %228 = vector.broadcast %227 : vector<2x1xi32> to vector<2x256xi32>
    %229 = arith.cmpi eq, %228, %7 : vector<2x256xi32>
    %230 = arith.ori %226, %229 : vector<2x256xi1>
    %231 = vector.extract_strided_slice %3 {offsets = [0, 56], sizes = [2, 1], strides = [1, 1]} : vector<2x128xi32> to vector<2x1xi32>
    %232 = vector.broadcast %231 : vector<2x1xi32> to vector<2x256xi32>
    %233 = arith.cmpi eq, %232, %7 : vector<2x256xi32>
    %234 = arith.ori %230, %233 : vector<2x256xi1>
    %235 = vector.extract_strided_slice %3 {offsets = [0, 57], sizes = [2, 1], strides = [1, 1]} : vector<2x128xi32> to vector<2x1xi32>
    %236 = vector.broadcast %235 : vector<2x1xi32> to vector<2x256xi32>
    %237 = arith.cmpi eq, %236, %7 : vector<2x256xi32>
    %238 = arith.ori %234, %237 : vector<2x256xi1>
    %239 = vector.extract_strided_slice %3 {offsets = [0, 58], sizes = [2, 1], strides = [1, 1]} : vector<2x128xi32> to vector<2x1xi32>
    %240 = vector.broadcast %239 : vector<2x1xi32> to vector<2x256xi32>
    %241 = arith.cmpi eq, %240, %7 : vector<2x256xi32>
    %242 = arith.ori %238, %241 : vector<2x256xi1>
    %243 = vector.extract_strided_slice %3 {offsets = [0, 59], sizes = [2, 1], strides = [1, 1]} : vector<2x128xi32> to vector<2x1xi32>
    %244 = vector.broadcast %243 : vector<2x1xi32> to vector<2x256xi32>
    %245 = arith.cmpi eq, %244, %7 : vector<2x256xi32>
    %246 = arith.ori %242, %245 : vector<2x256xi1>
    %247 = vector.extract_strided_slice %3 {offsets = [0, 60], sizes = [2, 1], strides = [1, 1]} : vector<2x128xi32> to vector<2x1xi32>
    %248 = vector.broadcast %247 : vector<2x1xi32> to vector<2x256xi32>
    %249 = arith.cmpi eq, %248, %7 : vector<2x256xi32>
    %250 = arith.ori %246, %249 : vector<2x256xi1>
    %251 = vector.extract_strided_slice %3 {offsets = [0, 61], sizes = [2, 1], strides = [1, 1]} : vector<2x128xi32> to vector<2x1xi32>
    %252 = vector.broadcast %251 : vector<2x1xi32> to vector<2x256xi32>
    %253 = arith.cmpi eq, %252, %7 : vector<2x256xi32>
    %254 = arith.ori %250, %253 : vector<2x256xi1>
    %255 = vector.extract_strided_slice %3 {offsets = [0, 62], sizes = [2, 1], strides = [1, 1]} : vector<2x128xi32> to vector<2x1xi32>
    %256 = vector.broadcast %255 : vector<2x1xi32> to vector<2x256xi32>
    %257 = arith.cmpi eq, %256, %7 : vector<2x256xi32>
    %258 = arith.ori %254, %257 : vector<2x256xi1>
    %259 = vector.extract_strided_slice %3 {offsets = [0, 63], sizes = [2, 1], strides = [1, 1]} : vector<2x128xi32> to vector<2x1xi32>
    %260 = vector.broadcast %259 : vector<2x1xi32> to vector<2x256xi32>
    %261 = arith.cmpi eq, %260, %7 : vector<2x256xi32>
    %262 = arith.ori %258, %261 : vector<2x256xi1>
    %263 = vector.extract_strided_slice %3 {offsets = [0, 64], sizes = [2, 1], strides = [1, 1]} : vector<2x128xi32> to vector<2x1xi32>
    %264 = vector.broadcast %263 : vector<2x1xi32> to vector<2x256xi32>
    %265 = arith.cmpi eq, %264, %7 : vector<2x256xi32>
    %266 = arith.ori %262, %265 : vector<2x256xi1>
    %267 = vector.extract_strided_slice %3 {offsets = [0, 65], sizes = [2, 1], strides = [1, 1]} : vector<2x128xi32> to vector<2x1xi32>
    %268 = vector.broadcast %267 : vector<2x1xi32> to vector<2x256xi32>
    %269 = arith.cmpi eq, %268, %7 : vector<2x256xi32>
    %270 = arith.ori %266, %269 : vector<2x256xi1>
    %271 = vector.extract_strided_slice %3 {offsets = [0, 66], sizes = [2, 1], strides = [1, 1]} : vector<2x128xi32> to vector<2x1xi32>
    %272 = vector.broadcast %271 : vector<2x1xi32> to vector<2x256xi32>
    %273 = arith.cmpi eq, %272, %7 : vector<2x256xi32>
    %274 = arith.ori %270, %273 : vector<2x256xi1>
    %275 = vector.extract_strided_slice %3 {offsets = [0, 67], sizes = [2, 1], strides = [1, 1]} : vector<2x128xi32> to vector<2x1xi32>
    %276 = vector.broadcast %275 : vector<2x1xi32> to vector<2x256xi32>
    %277 = arith.cmpi eq, %276, %7 : vector<2x256xi32>
    %278 = arith.ori %274, %277 : vector<2x256xi1>
    %279 = vector.extract_strided_slice %3 {offsets = [0, 68], sizes = [2, 1], strides = [1, 1]} : vector<2x128xi32> to vector<2x1xi32>
    %280 = vector.broadcast %279 : vector<2x1xi32> to vector<2x256xi32>
    %281 = arith.cmpi eq, %280, %7 : vector<2x256xi32>
    %282 = arith.ori %278, %281 : vector<2x256xi1>
    %283 = vector.extract_strided_slice %3 {offsets = [0, 69], sizes = [2, 1], strides = [1, 1]} : vector<2x128xi32> to vector<2x1xi32>
    %284 = vector.broadcast %283 : vector<2x1xi32> to vector<2x256xi32>
    %285 = arith.cmpi eq, %284, %7 : vector<2x256xi32>
    %286 = arith.ori %282, %285 : vector<2x256xi1>
    %287 = vector.extract_strided_slice %3 {offsets = [0, 70], sizes = [2, 1], strides = [1, 1]} : vector<2x128xi32> to vector<2x1xi32>
    %288 = vector.broadcast %287 : vector<2x1xi32> to vector<2x256xi32>
    %289 = arith.cmpi eq, %288, %7 : vector<2x256xi32>
    %290 = arith.ori %286, %289 : vector<2x256xi1>
    %291 = vector.extract_strided_slice %3 {offsets = [0, 71], sizes = [2, 1], strides = [1, 1]} : vector<2x128xi32> to vector<2x1xi32>
    %292 = vector.broadcast %291 : vector<2x1xi32> to vector<2x256xi32>
    %293 = arith.cmpi eq, %292, %7 : vector<2x256xi32>
    %294 = arith.ori %290, %293 : vector<2x256xi1>
    %295 = vector.extract_strided_slice %3 {offsets = [0, 72], sizes = [2, 1], strides = [1, 1]} : vector<2x128xi32> to vector<2x1xi32>
    %296 = vector.broadcast %295 : vector<2x1xi32> to vector<2x256xi32>
    %297 = arith.cmpi eq, %296, %7 : vector<2x256xi32>
    %298 = arith.ori %294, %297 : vector<2x256xi1>
    %299 = vector.extract_strided_slice %3 {offsets = [0, 73], sizes = [2, 1], strides = [1, 1]} : vector<2x128xi32> to vector<2x1xi32>
    %300 = vector.broadcast %299 : vector<2x1xi32> to vector<2x256xi32>
    %301 = arith.cmpi eq, %300, %7 : vector<2x256xi32>
    %302 = arith.ori %298, %301 : vector<2x256xi1>
    %303 = vector.extract_strided_slice %3 {offsets = [0, 74], sizes = [2, 1], strides = [1, 1]} : vector<2x128xi32> to vector<2x1xi32>
    %304 = vector.broadcast %303 : vector<2x1xi32> to vector<2x256xi32>
    %305 = arith.cmpi eq, %304, %7 : vector<2x256xi32>
    %306 = arith.ori %302, %305 : vector<2x256xi1>
    %307 = vector.extract_strided_slice %3 {offsets = [0, 75], sizes = [2, 1], strides = [1, 1]} : vector<2x128xi32> to vector<2x1xi32>
    %308 = vector.broadcast %307 : vector<2x1xi32> to vector<2x256xi32>
    %309 = arith.cmpi eq, %308, %7 : vector<2x256xi32>
    %310 = arith.ori %306, %309 : vector<2x256xi1>
    %311 = vector.extract_strided_slice %3 {offsets = [0, 76], sizes = [2, 1], strides = [1, 1]} : vector<2x128xi32> to vector<2x1xi32>
    %312 = vector.broadcast %311 : vector<2x1xi32> to vector<2x256xi32>
    %313 = arith.cmpi eq, %312, %7 : vector<2x256xi32>
    %314 = arith.ori %310, %313 : vector<2x256xi1>
    %315 = vector.extract_strided_slice %3 {offsets = [0, 77], sizes = [2, 1], strides = [1, 1]} : vector<2x128xi32> to vector<2x1xi32>
    %316 = vector.broadcast %315 : vector<2x1xi32> to vector<2x256xi32>
    %317 = arith.cmpi eq, %316, %7 : vector<2x256xi32>
    %318 = arith.ori %314, %317 : vector<2x256xi1>
    %319 = vector.extract_strided_slice %3 {offsets = [0, 78], sizes = [2, 1], strides = [1, 1]} : vector<2x128xi32> to vector<2x1xi32>
    %320 = vector.broadcast %319 : vector<2x1xi32> to vector<2x256xi32>
    %321 = arith.cmpi eq, %320, %7 : vector<2x256xi32>
    %322 = arith.ori %318, %321 : vector<2x256xi1>
    %323 = vector.extract_strided_slice %3 {offsets = [0, 79], sizes = [2, 1], strides = [1, 1]} : vector<2x128xi32> to vector<2x1xi32>
    %324 = vector.broadcast %323 : vector<2x1xi32> to vector<2x256xi32>
    %325 = arith.cmpi eq, %324, %7 : vector<2x256xi32>
    %326 = arith.ori %322, %325 : vector<2x256xi1>
    %327 = vector.extract_strided_slice %3 {offsets = [0, 80], sizes = [2, 1], strides = [1, 1]} : vector<2x128xi32> to vector<2x1xi32>
    %328 = vector.broadcast %327 : vector<2x1xi32> to vector<2x256xi32>
    %329 = arith.cmpi eq, %328, %7 : vector<2x256xi32>
    %330 = arith.ori %326, %329 : vector<2x256xi1>
    %331 = vector.extract_strided_slice %3 {offsets = [0, 81], sizes = [2, 1], strides = [1, 1]} : vector<2x128xi32> to vector<2x1xi32>
    %332 = vector.broadcast %331 : vector<2x1xi32> to vector<2x256xi32>
    %333 = arith.cmpi eq, %332, %7 : vector<2x256xi32>
    %334 = arith.ori %330, %333 : vector<2x256xi1>
    %335 = vector.extract_strided_slice %3 {offsets = [0, 82], sizes = [2, 1], strides = [1, 1]} : vector<2x128xi32> to vector<2x1xi32>
    %336 = vector.broadcast %335 : vector<2x1xi32> to vector<2x256xi32>
    %337 = arith.cmpi eq, %336, %7 : vector<2x256xi32>
    %338 = arith.ori %334, %337 : vector<2x256xi1>
    %339 = vector.extract_strided_slice %3 {offsets = [0, 83], sizes = [2, 1], strides = [1, 1]} : vector<2x128xi32> to vector<2x1xi32>
    %340 = vector.broadcast %339 : vector<2x1xi32> to vector<2x256xi32>
    %341 = arith.cmpi eq, %340, %7 : vector<2x256xi32>
    %342 = arith.ori %338, %341 : vector<2x256xi1>
    %343 = vector.extract_strided_slice %3 {offsets = [0, 84], sizes = [2, 1], strides = [1, 1]} : vector<2x128xi32> to vector<2x1xi32>
    %344 = vector.broadcast %343 : vector<2x1xi32> to vector<2x256xi32>
    %345 = arith.cmpi eq, %344, %7 : vector<2x256xi32>
    %346 = arith.ori %342, %345 : vector<2x256xi1>
    %347 = vector.extract_strided_slice %3 {offsets = [0, 85], sizes = [2, 1], strides = [1, 1]} : vector<2x128xi32> to vector<2x1xi32>
    %348 = vector.broadcast %347 : vector<2x1xi32> to vector<2x256xi32>
    %349 = arith.cmpi eq, %348, %7 : vector<2x256xi32>
    %350 = arith.ori %346, %349 : vector<2x256xi1>
    %351 = vector.extract_strided_slice %3 {offsets = [0, 86], sizes = [2, 1], strides = [1, 1]} : vector<2x128xi32> to vector<2x1xi32>
    %352 = vector.broadcast %351 : vector<2x1xi32> to vector<2x256xi32>
    %353 = arith.cmpi eq, %352, %7 : vector<2x256xi32>
    %354 = arith.ori %350, %353 : vector<2x256xi1>
    %355 = vector.extract_strided_slice %3 {offsets = [0, 87], sizes = [2, 1], strides = [1, 1]} : vector<2x128xi32> to vector<2x1xi32>
    %356 = vector.broadcast %355 : vector<2x1xi32> to vector<2x256xi32>
    %357 = arith.cmpi eq, %356, %7 : vector<2x256xi32>
    %358 = arith.ori %354, %357 : vector<2x256xi1>
    %359 = vector.extract_strided_slice %3 {offsets = [0, 88], sizes = [2, 1], strides = [1, 1]} : vector<2x128xi32> to vector<2x1xi32>
    %360 = vector.broadcast %359 : vector<2x1xi32> to vector<2x256xi32>
    %361 = arith.cmpi eq, %360, %7 : vector<2x256xi32>
    %362 = arith.ori %358, %361 : vector<2x256xi1>
    %363 = vector.extract_strided_slice %3 {offsets = [0, 89], sizes = [2, 1], strides = [1, 1]} : vector<2x128xi32> to vector<2x1xi32>
    %364 = vector.broadcast %363 : vector<2x1xi32> to vector<2x256xi32>
    %365 = arith.cmpi eq, %364, %7 : vector<2x256xi32>
    %366 = arith.ori %362, %365 : vector<2x256xi1>
    %367 = vector.extract_strided_slice %3 {offsets = [0, 90], sizes = [2, 1], strides = [1, 1]} : vector<2x128xi32> to vector<2x1xi32>
    %368 = vector.broadcast %367 : vector<2x1xi32> to vector<2x256xi32>
    %369 = arith.cmpi eq, %368, %7 : vector<2x256xi32>
    %370 = arith.ori %366, %369 : vector<2x256xi1>
    %371 = vector.extract_strided_slice %3 {offsets = [0, 91], sizes = [2, 1], strides = [1, 1]} : vector<2x128xi32> to vector<2x1xi32>
    %372 = vector.broadcast %371 : vector<2x1xi32> to vector<2x256xi32>
    %373 = arith.cmpi eq, %372, %7 : vector<2x256xi32>
    %374 = arith.ori %370, %373 : vector<2x256xi1>
    %375 = vector.extract_strided_slice %3 {offsets = [0, 92], sizes = [2, 1], strides = [1, 1]} : vector<2x128xi32> to vector<2x1xi32>
    %376 = vector.broadcast %375 : vector<2x1xi32> to vector<2x256xi32>
    %377 = arith.cmpi eq, %376, %7 : vector<2x256xi32>
    %378 = arith.ori %374, %377 : vector<2x256xi1>
    %379 = vector.extract_strided_slice %3 {offsets = [0, 93], sizes = [2, 1], strides = [1, 1]} : vector<2x128xi32> to vector<2x1xi32>
    %380 = vector.broadcast %379 : vector<2x1xi32> to vector<2x256xi32>
    %381 = arith.cmpi eq, %380, %7 : vector<2x256xi32>
    %382 = arith.ori %378, %381 : vector<2x256xi1>
    %383 = vector.extract_strided_slice %3 {offsets = [0, 94], sizes = [2, 1], strides = [1, 1]} : vector<2x128xi32> to vector<2x1xi32>
    %384 = vector.broadcast %383 : vector<2x1xi32> to vector<2x256xi32>
    %385 = arith.cmpi eq, %384, %7 : vector<2x256xi32>
    %386 = arith.ori %382, %385 : vector<2x256xi1>
    %387 = vector.extract_strided_slice %3 {offsets = [0, 95], sizes = [2, 1], strides = [1, 1]} : vector<2x128xi32> to vector<2x1xi32>
    %388 = vector.broadcast %387 : vector<2x1xi32> to vector<2x256xi32>
    %389 = arith.cmpi eq, %388, %7 : vector<2x256xi32>
    %390 = arith.ori %386, %389 : vector<2x256xi1>
    %391 = vector.extract_strided_slice %3 {offsets = [0, 96], sizes = [2, 1], strides = [1, 1]} : vector<2x128xi32> to vector<2x1xi32>
    %392 = vector.broadcast %391 : vector<2x1xi32> to vector<2x256xi32>
    %393 = arith.cmpi eq, %392, %7 : vector<2x256xi32>
    %394 = arith.ori %390, %393 : vector<2x256xi1>
    %395 = vector.extract_strided_slice %3 {offsets = [0, 97], sizes = [2, 1], strides = [1, 1]} : vector<2x128xi32> to vector<2x1xi32>
    %396 = vector.broadcast %395 : vector<2x1xi32> to vector<2x256xi32>
    %397 = arith.cmpi eq, %396, %7 : vector<2x256xi32>
    %398 = arith.ori %394, %397 : vector<2x256xi1>
    %399 = vector.extract_strided_slice %3 {offsets = [0, 98], sizes = [2, 1], strides = [1, 1]} : vector<2x128xi32> to vector<2x1xi32>
    %400 = vector.broadcast %399 : vector<2x1xi32> to vector<2x256xi32>
    %401 = arith.cmpi eq, %400, %7 : vector<2x256xi32>
    %402 = arith.ori %398, %401 : vector<2x256xi1>
    %403 = vector.extract_strided_slice %3 {offsets = [0, 99], sizes = [2, 1], strides = [1, 1]} : vector<2x128xi32> to vector<2x1xi32>
    %404 = vector.broadcast %403 : vector<2x1xi32> to vector<2x256xi32>
    %405 = arith.cmpi eq, %404, %7 : vector<2x256xi32>
    %406 = arith.ori %402, %405 : vector<2x256xi1>
    %407 = vector.extract_strided_slice %3 {offsets = [0, 100], sizes = [2, 1], strides = [1, 1]} : vector<2x128xi32> to vector<2x1xi32>
    %408 = vector.broadcast %407 : vector<2x1xi32> to vector<2x256xi32>
    %409 = arith.cmpi eq, %408, %7 : vector<2x256xi32>
    %410 = arith.ori %406, %409 : vector<2x256xi1>
    %411 = vector.extract_strided_slice %3 {offsets = [0, 101], sizes = [2, 1], strides = [1, 1]} : vector<2x128xi32> to vector<2x1xi32>
    %412 = vector.broadcast %411 : vector<2x1xi32> to vector<2x256xi32>
    %413 = arith.cmpi eq, %412, %7 : vector<2x256xi32>
    %414 = arith.ori %410, %413 : vector<2x256xi1>
    %415 = vector.extract_strided_slice %3 {offsets = [0, 102], sizes = [2, 1], strides = [1, 1]} : vector<2x128xi32> to vector<2x1xi32>
    %416 = vector.broadcast %415 : vector<2x1xi32> to vector<2x256xi32>
    %417 = arith.cmpi eq, %416, %7 : vector<2x256xi32>
    %418 = arith.ori %414, %417 : vector<2x256xi1>
    %419 = vector.extract_strided_slice %3 {offsets = [0, 103], sizes = [2, 1], strides = [1, 1]} : vector<2x128xi32> to vector<2x1xi32>
    %420 = vector.broadcast %419 : vector<2x1xi32> to vector<2x256xi32>
    %421 = arith.cmpi eq, %420, %7 : vector<2x256xi32>
    %422 = arith.ori %418, %421 : vector<2x256xi1>
    %423 = vector.extract_strided_slice %3 {offsets = [0, 104], sizes = [2, 1], strides = [1, 1]} : vector<2x128xi32> to vector<2x1xi32>
    %424 = vector.broadcast %423 : vector<2x1xi32> to vector<2x256xi32>
    %425 = arith.cmpi eq, %424, %7 : vector<2x256xi32>
    %426 = arith.ori %422, %425 : vector<2x256xi1>
    %427 = vector.extract_strided_slice %3 {offsets = [0, 105], sizes = [2, 1], strides = [1, 1]} : vector<2x128xi32> to vector<2x1xi32>
    %428 = vector.broadcast %427 : vector<2x1xi32> to vector<2x256xi32>
    %429 = arith.cmpi eq, %428, %7 : vector<2x256xi32>
    %430 = arith.ori %426, %429 : vector<2x256xi1>
    %431 = vector.extract_strided_slice %3 {offsets = [0, 106], sizes = [2, 1], strides = [1, 1]} : vector<2x128xi32> to vector<2x1xi32>
    %432 = vector.broadcast %431 : vector<2x1xi32> to vector<2x256xi32>
    %433 = arith.cmpi eq, %432, %7 : vector<2x256xi32>
    %434 = arith.ori %430, %433 : vector<2x256xi1>
    %435 = vector.extract_strided_slice %3 {offsets = [0, 107], sizes = [2, 1], strides = [1, 1]} : vector<2x128xi32> to vector<2x1xi32>
    %436 = vector.broadcast %435 : vector<2x1xi32> to vector<2x256xi32>
    %437 = arith.cmpi eq, %436, %7 : vector<2x256xi32>
    %438 = arith.ori %434, %437 : vector<2x256xi1>
    %439 = vector.extract_strided_slice %3 {offsets = [0, 108], sizes = [2, 1], strides = [1, 1]} : vector<2x128xi32> to vector<2x1xi32>
    %440 = vector.broadcast %439 : vector<2x1xi32> to vector<2x256xi32>
    %441 = arith.cmpi eq, %440, %7 : vector<2x256xi32>
    %442 = arith.ori %438, %441 : vector<2x256xi1>
    %443 = vector.extract_strided_slice %3 {offsets = [0, 109], sizes = [2, 1], strides = [1, 1]} : vector<2x128xi32> to vector<2x1xi32>
    %444 = vector.broadcast %443 : vector<2x1xi32> to vector<2x256xi32>
    %445 = arith.cmpi eq, %444, %7 : vector<2x256xi32>
    %446 = arith.ori %442, %445 : vector<2x256xi1>
    %447 = vector.extract_strided_slice %3 {offsets = [0, 110], sizes = [2, 1], strides = [1, 1]} : vector<2x128xi32> to vector<2x1xi32>
    %448 = vector.broadcast %447 : vector<2x1xi32> to vector<2x256xi32>
    %449 = arith.cmpi eq, %448, %7 : vector<2x256xi32>
    %450 = arith.ori %446, %449 : vector<2x256xi1>
    %451 = vector.extract_strided_slice %3 {offsets = [0, 111], sizes = [2, 1], strides = [1, 1]} : vector<2x128xi32> to vector<2x1xi32>
    %452 = vector.broadcast %451 : vector<2x1xi32> to vector<2x256xi32>
    %453 = arith.cmpi eq, %452, %7 : vector<2x256xi32>
    %454 = arith.ori %450, %453 : vector<2x256xi1>
    %455 = vector.extract_strided_slice %3 {offsets = [0, 112], sizes = [2, 1], strides = [1, 1]} : vector<2x128xi32> to vector<2x1xi32>
    %456 = vector.broadcast %455 : vector<2x1xi32> to vector<2x256xi32>
    %457 = arith.cmpi eq, %456, %7 : vector<2x256xi32>
    %458 = arith.ori %454, %457 : vector<2x256xi1>
    %459 = vector.extract_strided_slice %3 {offsets = [0, 113], sizes = [2, 1], strides = [1, 1]} : vector<2x128xi32> to vector<2x1xi32>
    %460 = vector.broadcast %459 : vector<2x1xi32> to vector<2x256xi32>
    %461 = arith.cmpi eq, %460, %7 : vector<2x256xi32>
    %462 = arith.ori %458, %461 : vector<2x256xi1>
    %463 = vector.extract_strided_slice %3 {offsets = [0, 114], sizes = [2, 1], strides = [1, 1]} : vector<2x128xi32> to vector<2x1xi32>
    %464 = vector.broadcast %463 : vector<2x1xi32> to vector<2x256xi32>
    %465 = arith.cmpi eq, %464, %7 : vector<2x256xi32>
    %466 = arith.ori %462, %465 : vector<2x256xi1>
    %467 = vector.extract_strided_slice %3 {offsets = [0, 115], sizes = [2, 1], strides = [1, 1]} : vector<2x128xi32> to vector<2x1xi32>
    %468 = vector.broadcast %467 : vector<2x1xi32> to vector<2x256xi32>
    %469 = arith.cmpi eq, %468, %7 : vector<2x256xi32>
    %470 = arith.ori %466, %469 : vector<2x256xi1>
    %471 = vector.extract_strided_slice %3 {offsets = [0, 116], sizes = [2, 1], strides = [1, 1]} : vector<2x128xi32> to vector<2x1xi32>
    %472 = vector.broadcast %471 : vector<2x1xi32> to vector<2x256xi32>
    %473 = arith.cmpi eq, %472, %7 : vector<2x256xi32>
    %474 = arith.ori %470, %473 : vector<2x256xi1>
    %475 = vector.extract_strided_slice %3 {offsets = [0, 117], sizes = [2, 1], strides = [1, 1]} : vector<2x128xi32> to vector<2x1xi32>
    %476 = vector.broadcast %475 : vector<2x1xi32> to vector<2x256xi32>
    %477 = arith.cmpi eq, %476, %7 : vector<2x256xi32>
    %478 = arith.ori %474, %477 : vector<2x256xi1>
    %479 = vector.extract_strided_slice %3 {offsets = [0, 118], sizes = [2, 1], strides = [1, 1]} : vector<2x128xi32> to vector<2x1xi32>
    %480 = vector.broadcast %479 : vector<2x1xi32> to vector<2x256xi32>
    %481 = arith.cmpi eq, %480, %7 : vector<2x256xi32>
    %482 = arith.ori %478, %481 : vector<2x256xi1>
    %483 = vector.extract_strided_slice %3 {offsets = [0, 119], sizes = [2, 1], strides = [1, 1]} : vector<2x128xi32> to vector<2x1xi32>
    %484 = vector.broadcast %483 : vector<2x1xi32> to vector<2x256xi32>
    %485 = arith.cmpi eq, %484, %7 : vector<2x256xi32>
    %486 = arith.ori %482, %485 : vector<2x256xi1>
    %487 = vector.extract_strided_slice %3 {offsets = [0, 120], sizes = [2, 1], strides = [1, 1]} : vector<2x128xi32> to vector<2x1xi32>
    %488 = vector.broadcast %487 : vector<2x1xi32> to vector<2x256xi32>
    %489 = arith.cmpi eq, %488, %7 : vector<2x256xi32>
    %490 = arith.ori %486, %489 : vector<2x256xi1>
    %491 = vector.extract_strided_slice %3 {offsets = [0, 121], sizes = [2, 1], strides = [1, 1]} : vector<2x128xi32> to vector<2x1xi32>
    %492 = vector.broadcast %491 : vector<2x1xi32> to vector<2x256xi32>
    %493 = arith.cmpi eq, %492, %7 : vector<2x256xi32>
    %494 = arith.ori %490, %493 : vector<2x256xi1>
    %495 = vector.extract_strided_slice %3 {offsets = [0, 122], sizes = [2, 1], strides = [1, 1]} : vector<2x128xi32> to vector<2x1xi32>
    %496 = vector.broadcast %495 : vector<2x1xi32> to vector<2x256xi32>
    %497 = arith.cmpi eq, %496, %7 : vector<2x256xi32>
    %498 = arith.ori %494, %497 : vector<2x256xi1>
    %499 = vector.extract_strided_slice %3 {offsets = [0, 123], sizes = [2, 1], strides = [1, 1]} : vector<2x128xi32> to vector<2x1xi32>
    %500 = vector.broadcast %499 : vector<2x1xi32> to vector<2x256xi32>
    %501 = arith.cmpi eq, %500, %7 : vector<2x256xi32>
    %502 = arith.ori %498, %501 : vector<2x256xi1>
    %503 = vector.extract_strided_slice %3 {offsets = [0, 124], sizes = [2, 1], strides = [1, 1]} : vector<2x128xi32> to vector<2x1xi32>
    %504 = vector.broadcast %503 : vector<2x1xi32> to vector<2x256xi32>
    %505 = arith.cmpi eq, %504, %7 : vector<2x256xi32>
    %506 = arith.ori %502, %505 : vector<2x256xi1>
    %507 = vector.extract_strided_slice %3 {offsets = [0, 125], sizes = [2, 1], strides = [1, 1]} : vector<2x128xi32> to vector<2x1xi32>
    %508 = vector.broadcast %507 : vector<2x1xi32> to vector<2x256xi32>
    %509 = arith.cmpi eq, %508, %7 : vector<2x256xi32>
    %510 = arith.ori %506, %509 : vector<2x256xi1>
    %511 = vector.extract_strided_slice %3 {offsets = [0, 126], sizes = [2, 1], strides = [1, 1]} : vector<2x128xi32> to vector<2x1xi32>
    %512 = vector.broadcast %511 : vector<2x1xi32> to vector<2x256xi32>
    %513 = arith.cmpi eq, %512, %7 : vector<2x256xi32>
    %514 = arith.ori %510, %513 : vector<2x256xi1>
    %515 = vector.extract_strided_slice %3 {offsets = [0, 127], sizes = [2, 1], strides = [1, 1]} : vector<2x128xi32> to vector<2x1xi32>
    %516 = vector.broadcast %515 : vector<2x1xi32> to vector<2x256xi32>
    %517 = arith.cmpi eq, %516, %7 : vector<2x256xi32>
    %518 = arith.ori %514, %517 : vector<2x256xi1>
    %c0_2 = arith.constant 0 : index
    %c0_3 = arith.constant 0 : index
    %519 = vector.load %arg4[%c0_2, %c0_3] : memref<2x256xi32, #tpu.memory_space<vmem>>, vector<2x256xi32>
    %520 = arith.extui %518 : vector<2x256xi1> to vector<2x256xi32>
    %521 = arith.ori %519, %520 : vector<2x256xi32>
    %c0_4 = arith.constant 0 : index
    %c0_5 = arith.constant 0 : index
    %522 = vector.load %arg4[%c0_4, %c0_5] : memref<2x256xi32, #tpu.memory_space<vmem>>, vector<2x256xi32>
    tpu.vector_store %arg4[%c0_4, %c0_5], %521 {strides = array<i32>} : memref<2x256xi32, #tpu.memory_space<vmem>>, vector<2x256xi32>,
    %c0_i32_6 = arith.constant 0 : i32
    %523 = arith.cmpi eq, %arg1, %c0_i32_6 : i32
    %524 = arith.extui %523 : i1 to i32
    %c0_i32_7 = arith.constant 0 : i32
    %525 = arith.cmpi ne, %524, %c0_i32_7 : i32
    scf.if %525 {
      %c0_8 = arith.constant 0 : index
      %c0_9 = arith.constant 0 : index
      %526 = vector.load %arg4[%c0_8, %c0_9] : memref<2x256xi32, #tpu.memory_space<vmem>>, vector<2x256xi32>
      %cst = arith.constant dense<-2147483648> : vector<256xi32>
      %527 = vector.multi_reduction <maxsi>, %526, %cst [0] : vector<2x256xi32> to vector<256xi32>
      %528 = vector.shape_cast %527 : vector<256xi32> to vector<1x256xi32>
      %529 = arith.sitofp %528 : vector<1x256xi32> to vector<1x256xf32>
      %c0_10 = arith.constant 0 : index
      %c0_11 = arith.constant 0 : index
      %530 = vector.load %arg3[%c0_10, %c0_11] : memref<1x256xf32, #tpu.memory_space<vmem>>, vector<1x256xf32>
      tpu.vector_store %arg3[%c0_10, %c0_11], %529 {strides = array<i32>} : memref<1x256xf32, #tpu.memory_space<vmem>>, vector<1x256xf32>,
    } else {
    }
    return
  }
  func.func @transform_0(%arg0: i32, %arg1: i32) -> (i32, i32) {
    %c0_i32 = arith.constant 0 : i32
    %c0_i32_0 = arith.constant 0 : i32
    return %arg1, %c0_i32 : i32, i32
  }
  func.func @transform_1(%arg0: i32, %arg1: i32) -> (i32, i32) {
    %c0_i32 = arith.constant 0 : i32
    %c0_i32_0 = arith.constant 0 : i32
    return %c0_i32, %arg0 : i32, i32
  }
}

</mosaic_0001>

<bundles_post_ra>
// kernel: tpu_custom_call.1
= control target key start
LH: loop header
LB: loop body
LE: loop exit
PB: predicated region body
PF: predicated region fallthrough
CT: control target
= control target key end

     0   :  { %6 = vsyncpa [#allocation4], 0  ;;  %s2297_s0 = inlined_call_operand.hbm [shape: s32[2,128], index: 0, kind: input, shape index: {}]   ;;  %s2298_s1 = inlined_call_operand.hbm [shape: f32[1,512], index: 1, kind: output, shape index: {}]  }
   0x1   :  { %7 = vsyncpa [#allocation5], 0 }
   0x2   :  { %9 = vsyncpa [#allocation5 + $0x1], 0  ;;  %s1759_s6 = smov 0   ;;  %s1761_s7 = smov 0  }
   0x3   :  { %s1763_s8 = smov 0   ;;  %s1765_s9 = smov 0  }
   0x4   :  { %s1767_s10 = smov 0   ;;  %s1769_s11 = smov 0  }
   0x5 LB: > { %s1170_s12 = sadd.s32 4294967295, %s1618_s11   ;;  %s1171_s13 = sadd.s32 4294967294, %s1618_s11   ;;  %s1618_s11 = sphi %s1769_s11, %s15_s11   ;;  %s1614_s10 = sphi %s1767_s10, %s2313_s10   ;;  %s1610_s9 = sphi %s1765_s9, %s2312_s9   ;;  %s1606_s8 = sphi %s1763_s8, %s2311_s8   ;;  %s1602_s7 = sphi %s1761_s7, %s2310_s7   ;;  %s1598_s6 = sphi %s1759_s6, %s2309_s6  }
   0x6   : > { %s27_s14 = sadd.s32 1, %s1614_s10  ;;  %s60_s15 = sadd.s32 1, %s1606_s8 }
   0x7   : > { %p29_p0 = scmp.ge.s32.totalorder %s27_s14, 2  ;;  %p70_p1 = scmp.ne.s32.totalorder %s1606_s8, %s1602_s7 }
   0x8   : > { %p71_p2 = scmp.eq.s32.totalorder %s1170_s12, 1  ;;  %p76_p3 = scmp.ne.s32.totalorder %s1602_s7, %s1598_s6 }
   0x9   : > { %s2315_s14 = smov (%p29_p0, %s27_s14), 0  ;;  %p77_p5 = scmp.eq.s32.totalorder %s1171_s13, 1 }
   0xa   : > { %p1799_p4 = por %p71_p2, %p70_p1  ;;  %s57_s17 = ssub.s32 %s1614_s10, %s2315_s14 }
   0xb   : > { %p1172_p6 = scmp.ge.s32.totalorder %s1618_s11, 1  ;;  %p58_p7 = scmp.eq.s32.totalorder %s57_s17, 0 }
   0xc   : > { %p1806_p8 = por %p77_p5, %p76_p3  ;;  %p84_p9 = scmp.lt.s32.totalorder %s1618_s11, 3 }
   0xd   : > { %s1812_s19 = scalar_select %p58_p7, %s1606_s8, %s60_s15  }
   0xe   : > { %p85_p10 = pnand %p1172_p6, %p84_p9  ;;  %p1196_p11 = scmp.eq.s32.totalorder %s1170_s12, 0 }
   0xf   : > { %s98_s22 = sshll.u32 %s2297_s0, 4  ;;  %s1620_s23 = smov [#allocation3]   ;;  %s99_s22 = int_to_ptr.hbm [resolvable:$true] %s98_s22 }
  0x10   : > { %p1188_p12 = pneg %p85_p10  ;;  %s100_s24 = sshll.u32 %s1620_s23, 4  ;;  %s101_s24 = int_to_ptr.vmem [resolvable:$true] %s100_s24 }
  0x11   : > { %113 = sbr.rel (%p85_p10) target bundleno = 638 (0x27e), region = 24 }
  0x12   : > { %p1189_p13 = pnand %p1196_p11, %p1188_p12 }
  0x14   : > { %1191 = dma.hbm_to_vmem [thread:$0]  (!%p1189_p13), %s99_s22, 32, %s101_s24, [#allocation4]  }
  0x16   : > { %1589 = dma.done.wait (%p1196_p11), [#allocation4], 32  }
  0x17   : > { %1591 = vsyncadd (%p1196_p11), [#allocation4], 4294967264  ;;  %v1621_v0 = vmov 2   ;;  %v1622_v1 = vmov 0   ;;  %v1623_v2 = vmov 4   ;;  %v1624_v4 = vmov 3  }
  0x18   : > { %1378 = vset.pattern.permute.xlu1 %v1621_v0  ;;  %1376 = vset.pattern.permute.xlu0 %v1622_v1  ;;  %134 = vst [vmem:[#allocation2] sm:$0xf] %v1622_v1  ;;  %v1819_v3 = vld [vmem:[#allocation3] sm:$0x3]  ;;  %v1625_v5 = vmov 1   ;;  %v1626_v6 = vmov 5   ;;  %v137_v37 = vlaneseq }
  0x19   : > { %1380 = vset.pattern.permute.xlu2 %v1623_v2  ;;  %156 = vperm.xlu1 %1378, %v1819_v3   ;;  %v1627_v7 = vmov 6   ;;  %v1628_v8 = vmov 8   ;;  %v1629_v9 = vmov 7   ;;  %v1630_v10 = vmov 9   ;;  %s1177_s25 = sshll.u32 %s1610_s9, 8  ;;  %s126_s26 = sand.u32 1, %s1602_s7  }
  0x1a   : > { %144 = vperm.xlu0 %1376, %v1819_v3   ;;  %170 = vperm.xlu2 %1380, %v1819_v3   ;;  %v1631_v11 = vmov 13   ;;  %v1632_v12 = vmov 10   ;;  %v1633_v13 = vmov 11   ;;  %v1634_v14 = vmov 18   ;;  %s1176_s27 = sshll.u32 %s126_s26, 1  ;;  %s1179_s28 = sshll.u32 %s1610_s9, 1 }
  0x1b   : > { %v1635_v15 = vmov 12   ;;  %v1636_v16 = vmov 14   ;;  %v1637_v17 = vmov 23   ;;  %v1638_v18 = vmov 15   ;;  %s1096_s2 = scalar_lea.hbm %s2298_s1, %s1179_s28  ;;  %s128_s3 = scalar_lea.vmem [#allocation6], %s1176_s27 }
  0x1c   : > { %v1639_v19 = vmov 16   ;;  %v1640_v20 = vmov 17   ;;  %v1641_v21 = vmov 28   ;;  %v1642_v22 = vmov 19   ;;  %s1098_s4 = sshll.u32 %s128_s3, 4  ;;  %s1100_s5 = sshll.u32 %s1096_s2, 4  ;;  %s1099_s4 = int_to_ptr.vmem [resolvable:$true] %s1098_s4  ;;  %s1101_s5 = int_to_ptr.hbm [resolvable:$true] %s1100_s5 }
  0x1d   : > { %v1643_v23 = vmov 20   ;;  %v1644_v24 = vmov 21   ;;  %v1645_v25 = vmov 22   ;;  %v1646_v26 = vmov 33   ;;  %s1086_s9 = scalar_lea.sflag [#allocation5], %s126_s26  ;;  %s1550_s12 = sshra.s32 %s1101_s5, 4  ;;  %s1551_s12 = int_to_ptr.hbm [resolvable:$true] %s1550_s12 }
  0x1e   : > { %v1647_v27 = vmov 24   ;;  %v1648_v28 = vmov 25   ;;  %v1649_v29 = vmov 26   ;;  %v1650_v30 = vmov 27   ;;  %s1552_s13 = scalar_lea.hbm %s1551_s12, 2  ;;  %s1556_s20 = scalar_lea.hbm %s2298_s1, 4 }
  0x1f   : > { %v1651_v32 = vmov 29   ;;  %v1652_v33 = vmov 30   ;;  %v1653_v34 = vmov 38   ;;  %v1654_v36 = vmov 31   ;;  %p1553_p0 = scmp.ne.s32.totalorder %s1551_s12, %s1552_s13  ;;  %p1557_p3 = scmp.lt.s32.totalorder %s1551_s12, %s2298_s1 }
  0x20   : > { %v1655_v38 = vmov 32   ;;  %v138_v40 = vand.u32 127, %v137_v37  ;;  %v1656_v43 = vmov 43   ;;  %v1657_v44 = vmov 34   ;;  %p1558_p5 = scmp.lt.s32.totalorder %s1556_s20, %s1552_s13 }
  0x21   : > { %1379 = vset.pattern.permute.xlu1 %v1624_v4  ;;  %v140_v46 = vstv %s1177_s25  ;;  %v1658_v47 = vmov 35   ;;  %v1659_v53 = vmov 36   ;;  %v1660_v54 = vmov 37   ;;  %p1554_p1 = pnand %p1553_p0, %p1799_p4 }
  0x22   : > { %1377 = vset.pattern.permute.xlu0 %v1625_v5  ;;  %163 = vperm.xlu1 %1379, %v1819_v3   ;;  %v139_v45 = vadd.s32 128, %v138_v40  ;;  %v1869_v49 = vadd.s32 %v140_v46, %v138_v40  ;;  %v1661_v58 = vmov 48   ;;  %v1662_v59 = vmov 39   ;;  %p1559_p6 = por %p1558_p5, %p1557_p3 }
  0x23   : > { %149 = vperm.xlu0 %1377, %v1819_v3   ;;  %1381 = vset.pattern.permute.xlu2 %v1626_v6  ;;  %v1663_v60 = vmov 40   ;;  %v1664_v63 = vmov 41   ;;  %v1665_v0 = vmov 42   ;;  %p1555_p2 = pneg %p1554_p1 }
  0x24   : > { %177 = vperm.xlu2 %1381, %v1819_v3   ;;  %v1871_v50 = vadd.s32 %v140_v46, %v139_v45  ;;  %v1685_v45 = vmov 62  }
  0x25   : > { %p1560_p7 = pnand %p1559_p6, %p1555_p2 }
  0x2a   : > { %1382 = vset.pattern.permute.xlu1 %v1627_v7  ;;  %v1666_v7 = vmov 53  }
  0x2b   : > { %1384 = vset.pattern.permute.xlu0 %v1628_v8  ;;  %184 = vperm.xlu1 %1382, %v1819_v3   ;;  %v1667_v8 = vmov 44  }
  0x2c   : > { %198 = vperm.xlu0 %1384, %v1819_v3   ;;  %1383 = vset.pattern.permute.xlu2 %v1629_v9  ;;  %v1668_v9 = vmov 45  }
  0x2d   : > { %191 = vperm.xlu2 %1383, %v1819_v3  }
  0x33   : > { %1385 = vset.pattern.permute.xlu1 %v1630_v10 }
  0x34   : > { %1389 = vset.pattern.permute.xlu0 %v1631_v11  ;;  %205 = vperm.xlu1 %1385, %v1819_v3  }
  0x35   : > { %233 = vperm.xlu0 %1389, %v1819_v3   ;;  %1386 = vset.pattern.permute.xlu2 %v1632_v12  ;;  %v1669_v12 = vmov 46  }
  0x36   : > { %212 = vperm.xlu2 %1386, %v1819_v3  }
  0x3c   : > { %1387 = vset.pattern.permute.xlu1 %v1633_v13  ;;  %v1670_v13 = vmov 47  }
  0x3d   : > { %1394 = vset.pattern.permute.xlu0 %v1634_v14  ;;  %219 = vperm.xlu1 %1387, %v1819_v3   ;;  %v1699_v14 = vmov 76  }
  0x3e   : > { %268 = vperm.xlu0 %1394, %v1819_v3   ;;  %1388 = vset.pattern.permute.xlu2 %v1635_v15 }
  0x3f   : > { %226 = vperm.xlu2 %1388, %v1819_v3  }
  0x45   : > { %1390 = vset.pattern.permute.xlu1 %v1636_v16 }
  0x46   : > { %1399 = vset.pattern.permute.xlu0 %v1637_v17  ;;  %240 = vperm.xlu1 %1390, %v1819_v3  }
  0x47   : > { %303 = vperm.xlu0 %1399, %v1819_v3   ;;  %1391 = vset.pattern.permute.xlu2 %v1638_v18  ;;  %v1671_v18 = vmov 58  }
  0x48   : > { %247 = vperm.xlu2 %1391, %v1819_v3  }
  0x4e   : > { %1392 = vset.pattern.permute.xlu1 %v1639_v19  ;;  %v1672_v19 = vmov 49  }
  0x4f   : > { %254 = vperm.xlu1 %1392, %v1819_v3   ;;  %1404 = vset.pattern.permute.xlu0 %v1641_v21 }
  0x50   : > { %1393 = vset.pattern.permute.xlu2 %v1640_v20  ;;  %338 = vperm.xlu0 %1404, %v1819_v3   ;;  %v1673_v20 = vmov 50  }
  0x51   : > { %261 = vperm.xlu2 %1393, %v1819_v3  }
  0x57   : > { %1395 = vset.pattern.permute.xlu1 %v1642_v22 }
  0x58   : > { %275 = vperm.xlu1 %1395, %v1819_v3   ;;  %1409 = vset.pattern.permute.xlu0 %v1646_v26 }
  0x59   : > { %1396 = vset.pattern.permute.xlu2 %v1643_v23  ;;  %373 = vperm.xlu0 %1409, %v1819_v3   ;;  %v1674_v23 = vmov 51  }
  0x5a   : > { %282 = vperm.xlu2 %1396, %v1819_v3  }
  0x60   : > { %1397 = vset.pattern.permute.xlu1 %v1644_v24  ;;  %v1675_v24 = vmov 52  }
  0x61   : > { %289 = vperm.xlu1 %1397, %v1819_v3   ;;  %1414 = vset.pattern.permute.xlu0 %v1653_v34  ;;  %v1680_v34 = vmov 57  }
  0x62   : > { %1398 = vset.pattern.permute.xlu2 %v1645_v25  ;;  %408 = vperm.xlu0 %1414, %v1819_v3  }
  0x63   : > { %296 = vperm.xlu2 %1398, %v1819_v3  }
  0x69   : > { %1400 = vset.pattern.permute.xlu1 %v1647_v27  ;;  %v1676_v27 = vmov 63  }
  0x6a   : > { %310 = vperm.xlu1 %1400, %v1819_v3   ;;  %1419 = vset.pattern.permute.xlu0 %v1656_v43 }
  0x6b   : > { %1401 = vset.pattern.permute.xlu2 %v1648_v28  ;;  %443 = vperm.xlu0 %1419, %v1819_v3   ;;  %v1677_v28 = vmov 54  }
  0x6c   : > { %317 = vperm.xlu2 %1401, %v1819_v3  }
  0x72   : > { %1402 = vset.pattern.permute.xlu1 %v1649_v29 }
  0x73   : > { %324 = vperm.xlu1 %1402, %v1819_v3   ;;  %1424 = vset.pattern.permute.xlu0 %v1661_v58 }
  0x74   : > { %1403 = vset.pattern.permute.xlu2 %v1650_v30  ;;  %v1850_v31 = vpop.permute.xlu2 %170  ;;  %478 = vperm.xlu0 %1424, %v1819_v3   ;;  %v1678_v30 = vmov 55  }
  0x75   : > { %331 = vperm.xlu2 %1403, %v1819_v3   ;;  %vm172_vm13 = vcmp.eq.s32.totalorder %v1850_v31, %v1869_v49  ;;  %vm173_vm15 = vcmp.eq.s32.totalorder %v1850_v31, %v1871_v50 }
  0x7b   : > { %1405 = vset.pattern.permute.xlu1 %v1651_v32 }
  0x7c   : > { %345 = vperm.xlu1 %1405, %v1819_v3   ;;  %1429 = vset.pattern.permute.xlu0 %v1666_v7 }
  0x7d   : > { %1406 = vset.pattern.permute.xlu2 %v1652_v33  ;;  %513 = vperm.xlu0 %1429, %v1819_v3   ;;  %v1679_v33 = vmov 56  }
  0x7e   : > { %352 = vperm.xlu2 %1406, %v1819_v3   ;;  %v1855_v35 = vpop.permute.xlu2 %177 }
  0x84   : > { %1407 = vset.pattern.permute.xlu1 %v1654_v36 }
  0x85   : > { %359 = vperm.xlu1 %1407, %v1819_v3   ;;  %1434 = vset.pattern.permute.xlu0 %v1671_v18  ;;  %v1701_v18 = vmov 88  }
  0x86   : > { %1408 = vset.pattern.permute.xlu2 %v1655_v38  ;;  %548 = vperm.xlu0 %1434, %v1819_v3   ;;  %v1681_v38 = vmov 68  }
  0x87   : > { %366 = vperm.xlu2 %1408, %v1819_v3   ;;  %v1860_v39 = vpop.permute.xlu2 %191 }
  0x8b   : > { %v157_v41 = vpop.permute.xlu1 %156 }
  0x8c   : > { %v145_v42 = vpop.permute.xlu0 %144  ;;  %vm158_vm5 = vcmp.eq.s32.totalorder %v157_v41, %v1869_v49  ;;  %vm159_vm7 = vcmp.eq.s32.totalorder %v157_v41, %v1871_v50  ;;  %v1683_v41 = vmov 60  }
  0x8d   : > { %1410 = vset.pattern.permute.xlu1 %v1657_v44  ;;  %vm146_vm0 = vcmp.eq.s32.totalorder %v145_v42, %v1869_v49  ;;  %vm147_vm1 = vcmp.eq.s32.totalorder %v145_v42, %v1871_v50  ;;  %v1684_v44 = vmov 61  }
  0x8e   : > { %380 = vperm.xlu1 %1410, %v1819_v3   ;;  %1439 = vset.pattern.permute.xlu0 %v1676_v27 }
  0x8f   : > { %1411 = vset.pattern.permute.xlu2 %v1658_v47  ;;  %583 = vperm.xlu0 %1439, %v1819_v3  }
  0x90   : > { %387 = vperm.xlu2 %1411, %v1819_v3   ;;  %v1867_v48 = vpop.permute.xlu2 %212 }
  0x94   : > { %v164_v51 = vpop.permute.xlu1 %163 }
  0x95   : > { %v150_v52 = vpop.permute.xlu0 %149  ;;  %vm165_vm9 = vcmp.eq.s32.totalorder %v164_v51, %v1869_v49  ;;  %vm166_vm11 = vcmp.eq.s32.totalorder %v164_v51, %v1871_v50  ;;  %v1687_v51 = vmov 64  }
  0x96   : > { %vm151_vm2 = vcmp.eq.s32.totalorder %v150_v52, %v1869_v49  ;;  %vm152_vm3 = vcmp.eq.s32.totalorder %v150_v52, %v1871_v50  ;;  %1412 = vset.pattern.permute.xlu1 %v1659_v53  ;;  %v1688_v53 = vmov 65  }
  0x97   : > { %vm153_vm4 = vmor %vm146_vm0, %vm151_vm2  ;;  %394 = vperm.xlu1 %1412, %v1819_v3   ;;  %vm179_vm2 = vcmp.eq.s32.totalorder %v1855_v35, %v1869_v49  ;;  %1444 = vset.pattern.permute.xlu0 %v1681_v38 }
  0x98   : > { %vm154_vm6 = vmor %vm147_vm1, %vm152_vm3  ;;  %1413 = vset.pattern.permute.xlu2 %v1660_v54  ;;  %vm180_vm3 = vcmp.eq.s32.totalorder %v1855_v35, %v1871_v50  ;;  %618 = vperm.xlu0 %1444, %v1819_v3  }
  0x99   : > { %vm160_vm8 = vmor %vm153_vm4, %vm158_vm5  ;;  %401 = vperm.xlu2 %1413, %v1819_v3   ;;  %v1882_v55 = vpop.permute.xlu2 %226 }
  0x9a   : > { %vm161_vm10 = vmor %vm154_vm6, %vm159_vm7 }
  0x9b   : > { %vm167_vm12 = vmor %vm160_vm8, %vm165_vm9  ;;  %vm193_vm8 = vcmp.eq.s32.totalorder %v1860_v39, %v1869_v49 }
  0x9c   : > { %vm168_vm14 = vmor %vm161_vm10, %vm166_vm11  ;;  %vm194_vm10 = vcmp.eq.s32.totalorder %v1860_v39, %v1871_v50  ;;  %v1682_v39 = vmov 59  }
  0x9d   : > { %vm174_vm0 = vmor %vm167_vm12, %vm172_vm13  ;;  %v185_v56 = vpop.permute.xlu1 %184 }
  0x9e   : > { %vm175_vm1 = vmor %vm168_vm14, %vm173_vm15  ;;  %vm186_vm5 = vcmp.eq.s32.totalorder %v185_v56, %v1869_v49  ;;  %vm187_vm6 = vcmp.eq.s32.totalorder %v185_v56, %v1871_v50  ;;  %v199_v57 = vpop.permute.xlu0 %198  ;;  %v1689_v56 = vmov 66  }
  0x9f   : > { %vm181_vm4 = vmor %vm174_vm0, %vm179_vm2  ;;  %1415 = vset.pattern.permute.xlu1 %v1662_v59  ;;  %vm200_vm12 = vcmp.eq.s32.totalorder %v199_v57, %v1869_v49  ;;  %vm201_vm14 = vcmp.eq.s32.totalorder %v199_v57, %v1871_v50  ;;  %v1690_v57 = vmov 67  }
  0xa0   : > { %vm182_vm7 = vmor %vm175_vm1, %vm180_vm3  ;;  %415 = vperm.xlu1 %1415, %v1819_v3  }
  0xa1   : > { %vm188_vm9 = vmor %vm181_vm4, %vm186_vm5  ;;  %1416 = vset.pattern.permute.xlu2 %v1663_v60  ;;  %vm214_vm4 = vcmp.eq.s32.totalorder %v1867_v48, %v1869_v49  ;;  %v1691_v60 = vmov 78  }
  0xa2   : > { %vm189_vm11 = vmor %vm182_vm7, %vm187_vm6  ;;  %422 = vperm.xlu2 %1416, %v1819_v3   ;;  %v248_v61 = vpop.permute.xlu2 %247  ;;  %vm215_vm6 = vcmp.eq.s32.totalorder %v1867_v48, %v1871_v50  ;;  %v1686_v48 = vmov 73  }
  0xa3   : > { %vm195_vm13 = vmor %vm188_vm9, %vm193_vm8  ;;  %1449 = vset.pattern.permute.xlu0 %v1686_v48 }
  0xa4   : > { %vm196_vm15 = vmor %vm189_vm11, %vm194_vm10  ;;  %653 = vperm.xlu0 %1449, %v1819_v3  }
  0xa5   : > { %vm202_vm0 = vmor %vm195_vm13, %vm200_vm12  ;;  %vm228_vm12 = vcmp.eq.s32.totalorder %v1882_v55, %v1869_v49 }
  0xa6   : > { %vm203_vm1 = vmor %vm196_vm15, %vm201_vm14  ;;  %v206_v62 = vpop.permute.xlu1 %205  ;;  %vm229_vm14 = vcmp.eq.s32.totalorder %v1882_v55, %v1871_v50 }
  0xa7   : > { %vm207_vm2 = vcmp.eq.s32.totalorder %v206_v62, %v1869_v49  ;;  %vm208_vm3 = vcmp.eq.s32.totalorder %v206_v62, %v1871_v50  ;;  %v234_v6 = vpop.permute.xlu0 %233 }
  0xa8   : > { %vm209_vm5 = vmor %vm202_vm0, %vm207_vm2  ;;  %1417 = vset.pattern.permute.xlu1 %v1664_v63  ;;  %vm235_vm0 = vcmp.eq.s32.totalorder %v234_v6, %v1869_v49  ;;  %vm236_vm2 = vcmp.eq.s32.totalorder %v234_v6, %v1871_v50  ;;  %v1693_v63 = vmov 70  }
  0xa9   : > { %vm210_vm7 = vmor %vm203_vm1, %vm208_vm3  ;;  %429 = vperm.xlu1 %1417, %v1819_v3  }
  0xaa   : > { %vm216_vm8 = vmor %vm209_vm5, %vm214_vm4  ;;  %1418 = vset.pattern.permute.xlu2 %v1665_v0 }
  0xab   : > { %vm1911_vm9 = vmor %vm210_vm7, %vm215_vm6  ;;  %436 = vperm.xlu2 %1418, %v1819_v3   ;;  %v262_v4 = vpop.permute.xlu2 %261 }
  0xac   : > { %1454 = vset.pattern.permute.xlu0 %v1691_v60 }
  0xad   : > { %688 = vperm.xlu0 %1454, %v1819_v3  }
  0xaf   : > { %v220_v5 = vpop.permute.xlu1 %219 }
  0xb0   : > { %vm221_vm10 = vcmp.eq.s32.totalorder %v220_v5, %v1869_v49  ;;  %vm222_vm11 = vcmp.eq.s32.totalorder %v220_v5, %v1871_v50  ;;  %v269_v17 = vpop.permute.xlu0 %268  ;;  %v1695_v5 = vmov 72  }
  0xb1   : > { %vm223_vm13 = vmor %vm216_vm8, %vm221_vm10  ;;  %1420 = vset.pattern.permute.xlu1 %v1667_v8  ;;  %vm249_vm8 = vcmp.eq.s32.totalorder %v248_v61, %v1869_v49  ;;  %vm250_vm10 = vcmp.eq.s32.totalorder %v248_v61, %v1871_v50  ;;  %v1692_v61 = vmov 69   ;;  %v1696_v8 = vmov 83  }
  0xb2   : > { %vm224_vm15 = vmor %vm1911_vm9, %vm222_vm11  ;;  %450 = vperm.xlu1 %1420, %v1819_v3  }
  0xb3   : > { %vm230_vm1 = vmor %vm223_vm13, %vm228_vm12  ;;  %1421 = vset.pattern.permute.xlu2 %v1668_v9  ;;  %v1697_v9 = vmov 74  }
  0xb4   : > { %vm231_vm3 = vmor %vm224_vm15, %vm229_vm14  ;;  %457 = vperm.xlu2 %1421, %v1819_v3   ;;  %v283_v10 = vpop.permute.xlu2 %282 }
  0xb5   : > { %vm237_vm4 = vmor %vm230_vm1, %vm235_vm0  ;;  %vm263_vm0 = vcmp.eq.s32.totalorder %v262_v4, %v1869_v49  ;;  %1459 = vset.pattern.permute.xlu0 %v1696_v8 }
  0xb6   : > { %vm238_vm5 = vmor %vm231_vm3, %vm236_vm2  ;;  %vm264_vm2 = vcmp.eq.s32.totalorder %v262_v4, %v1871_v50  ;;  %v1694_v4 = vmov 71   ;;  %723 = vperm.xlu0 %1459, %v1819_v3  }
  0xb8   : > { %v241_v11 = vpop.permute.xlu1 %240 }
  0xb9   : > { %vm242_vm6 = vcmp.eq.s32.totalorder %v241_v11, %v1869_v49  ;;  %vm243_vm7 = vcmp.eq.s32.totalorder %v241_v11, %v1871_v50  ;;  %v304_v29 = vpop.permute.xlu0 %303  ;;  %v1698_v11 = vmov 75  }
  0xba   : > { %vm244_vm9 = vmor %vm237_vm4, %vm242_vm6  ;;  %1422 = vset.pattern.permute.xlu1 %v1669_v12  ;;  %vm270_vm4 = vcmp.eq.s32.totalorder %v269_v17, %v1869_v49 }
  0xbb   : > { %vm245_vm11 = vmor %vm238_vm5, %vm243_vm7  ;;  %464 = vperm.xlu1 %1422, %v1819_v3  }
  0xbc   : > { %vm251_vm12 = vmor %vm244_vm9, %vm249_vm8  ;;  %1423 = vset.pattern.permute.xlu2 %v1670_v13  ;;  %vm271_vm8 = vcmp.eq.s32.totalorder %v269_v17, %v1871_v50 }
  0xbd   : > { %vm1934_vm13 = vmor %vm245_vm11, %vm250_vm10  ;;  %471 = vperm.xlu2 %1423, %v1819_v3   ;;  %v297_v15 = vpop.permute.xlu2 %296 }
  0xbe   : > { %1464 = vset.pattern.permute.xlu0 %v1701_v18 }
  0xbf   : > { %758 = vperm.xlu0 %1464, %v1819_v3  }
  0xc1   : > { %v255_v16 = vpop.permute.xlu1 %254 }
  0xc2   : > { %vm256_vm14 = vcmp.eq.s32.totalorder %v255_v16, %v1869_v49  ;;  %vm257_vm15 = vcmp.eq.s32.totalorder %v255_v16, %v1871_v50  ;;  %v339_v40 = vpop.permute.xlu0 %338 }
  0xc3   : > { %vm258_vm1 = vmor %vm251_vm12, %vm256_vm14  ;;  %1425 = vset.pattern.permute.xlu1 %v1672_v19  ;;  %vm284_vm12 = vcmp.eq.s32.totalorder %v283_v10, %v1869_v49  ;;  %vm285_vm14 = vcmp.eq.s32.totalorder %v283_v10, %v1871_v50  ;;  %v1702_v19 = vmov 79  }
  0xc4   : > { %vm259_vm3 = vmor %vm1934_vm13, %vm257_vm15  ;;  %485 = vperm.xlu1 %1425, %v1819_v3  }
  0xc5   : > { %vm265_vm5 = vmor %vm258_vm1, %vm263_vm0  ;;  %1426 = vset.pattern.permute.xlu2 %v1673_v20 }
  0xc6   : > { %vm266_vm6 = vmor %vm259_vm3, %vm264_vm2  ;;  %492 = vperm.xlu2 %1426, %v1819_v3   ;;  %v318_v21 = vpop.permute.xlu2 %317 }
  0xc7   : > { %vm272_vm7 = vmor %vm265_vm5, %vm270_vm4  ;;  %vm298_vm4 = vcmp.eq.s32.totalorder %v297_v15, %v1869_v49 }
  0xc8   : > { %vm273_vm9 = vmor %vm266_vm6, %vm271_vm8  ;;  %vm299_vm6 = vcmp.eq.s32.totalorder %v297_v15, %v1871_v50  ;;  %v1700_v15 = vmov 77  }
  0xca   : > { %v276_v22 = vpop.permute.xlu1 %275 }
  0xcb   : > { %vm277_vm10 = vcmp.eq.s32.totalorder %v276_v22, %v1869_v49  ;;  %vm278_vm11 = vcmp.eq.s32.totalorder %v276_v22, %v1871_v50  ;;  %v374_v52 = vpop.permute.xlu0 %373 }
  0xcc   : > { %vm279_vm13 = vmor %vm272_vm7, %vm277_vm10  ;;  %1427 = vset.pattern.permute.xlu1 %v1674_v23  ;;  %vm305_vm10 = vcmp.eq.s32.totalorder %v304_v29, %v1869_v49 }
  0xcd   : > { %vm280_vm15 = vmor %vm273_vm9, %vm278_vm11  ;;  %499 = vperm.xlu1 %1427, %v1819_v3   ;;  %vm306_vm11 = vcmp.eq.s32.totalorder %v304_v29, %v1871_v50  ;;  %v1706_v29 = vmov 93  }
  0xce   : > { %vm286_vm0 = vmor %vm279_vm13, %vm284_vm12  ;;  %1428 = vset.pattern.permute.xlu2 %v1675_v24  ;;  %v1704_v24 = vmov 81   ;;  %1469 = vset.pattern.permute.xlu0 %v1706_v29 }
  0xcf   : > { %vm287_vm1 = vmor %vm280_vm15, %vm285_vm14  ;;  %506 = vperm.xlu2 %1428, %v1819_v3   ;;  %v332_v25 = vpop.permute.xlu2 %331 }
  0xd3   : > { %v290_v26 = vpop.permute.xlu1 %289 }
  0xd4   : > { %vm291_vm2 = vcmp.eq.s32.totalorder %v290_v26, %v1869_v49  ;;  %vm292_vm3 = vcmp.eq.s32.totalorder %v290_v26, %v1871_v50  ;;  %v409_v62 = vpop.permute.xlu0 %408  ;;  %v1734_v26 = vmov 111  }
  0xd5   : > { %vm293_vm5 = vmor %vm286_vm0, %vm291_vm2  ;;  %1430 = vset.pattern.permute.xlu1 %v1677_v28  ;;  %vm319_vm0 = vcmp.eq.s32.totalorder %v318_v21, %v1869_v49  ;;  %vm320_vm2 = vcmp.eq.s32.totalorder %v318_v21, %v1871_v50  ;;  %v1703_v21 = vmov 80  }
  0xd6   : > { %vm294_vm7 = vmor %vm287_vm1, %vm292_vm3  ;;  %520 = vperm.xlu1 %1430, %v1819_v3  }
  0xd7   : > { %vm300_vm8 = vmor %vm293_vm5, %vm298_vm4  ;;  %1431 = vset.pattern.permute.xlu2 %v1678_v30  ;;  %v1707_v30 = vmov 84  }
  0xd8   : > { %vm301_vm9 = vmor %vm294_vm7, %vm299_vm6  ;;  %527 = vperm.xlu2 %1431, %v1819_v3   ;;  %v353_v31 = vpop.permute.xlu2 %352 }
  0xd9   : > { %vm307_vm12 = vmor %vm300_vm8, %vm305_vm10  ;;  %vm333_vm8 = vcmp.eq.s32.totalorder %v332_v25, %v1869_v49  ;;  %vm334_vm10 = vcmp.eq.s32.totalorder %v332_v25, %v1871_v50  ;;  %v1705_v25 = vmov 82  }
  0xda   : > { %vm308_vm13 = vmor %vm301_vm9, %vm306_vm11 }
  0xdc   : > { %v311_v32 = vpop.permute.xlu1 %310 }
  0xdd   : > { %vm312_vm14 = vcmp.eq.s32.totalorder %v311_v32, %v1869_v49  ;;  %vm313_vm15 = vcmp.eq.s32.totalorder %v311_v32, %v1871_v50  ;;  %v444_v10 = vpop.permute.xlu0 %443  ;;  %v1708_v32 = vmov 85  }
  0xde   : > { %vm314_vm1 = vmor %vm307_vm12, %vm312_vm14  ;;  %1432 = vset.pattern.permute.xlu1 %v1679_v33  ;;  %vm340_vm14 = vcmp.eq.s32.totalorder %v339_v40, %v1869_v49 }
  0xdf   : > { %vm315_vm3 = vmor %vm308_vm13, %vm313_vm15  ;;  %534 = vperm.xlu1 %1432, %v1819_v3   ;;  %vm341_vm15 = vcmp.eq.s32.totalorder %v339_v40, %v1871_v50  ;;  %v1711_v40 = vmov 98  }
  0xe0   : > { %vm321_vm4 = vmor %vm314_vm1, %vm319_vm0  ;;  %1433 = vset.pattern.permute.xlu2 %v1680_v34 }
  0xe1   : > { %vm322_vm5 = vmor %vm315_vm3, %vm320_vm2  ;;  %541 = vperm.xlu2 %1433, %v1819_v3   ;;  %v367_v35 = vpop.permute.xlu2 %366 }
  0xe5   : > { %v325_v36 = vpop.permute.xlu1 %324 }
  0xe6   : > { %vm326_vm6 = vcmp.eq.s32.totalorder %v325_v36, %v1869_v49  ;;  %vm327_vm7 = vcmp.eq.s32.totalorder %v325_v36, %v1871_v50  ;;  %v479_v20 = vpop.permute.xlu0 %478  ;;  %v1710_v36 = vmov 87  }
  0xe7   : > { %vm328_vm9 = vmor %vm321_vm4, %vm326_vm6  ;;  %1435 = vset.pattern.permute.xlu1 %v1682_v39  ;;  %vm354_vm4 = vcmp.eq.s32.totalorder %v353_v31, %v1869_v49  ;;  %vm355_vm6 = vcmp.eq.s32.totalorder %v353_v31, %v1871_v50  ;;  %v2054_v31 = vld [vmem:[#allocation3] sm:$0x3] }
  0xe8   : > { %vm329_vm11 = vmor %vm322_vm5, %vm327_vm7  ;;  %555 = vperm.xlu1 %1435, %v1819_v3   ;;  %793 = vperm.xlu0 %1469, %v2054_v31  }
  0xe9   : > { %vm335_vm12 = vmor %vm328_vm9, %vm333_vm8  ;;  %1436 = vset.pattern.permute.xlu2 %v1683_v41  ;;  %v1712_v41 = vmov 89  }
  0xea   : > { %vm336_vm13 = vmor %vm329_vm11, %vm334_vm10  ;;  %562 = vperm.xlu2 %1436, %v1819_v3   ;;  %v388_v42 = vpop.permute.xlu2 %387 }
  0xeb   : > { %vm342_vm0 = vmor %vm335_vm12, %vm340_vm14  ;;  %vm368_vm12 = vcmp.eq.s32.totalorder %v367_v35, %v1869_v49  ;;  %vm369_vm14 = vcmp.eq.s32.totalorder %v367_v35, %v1871_v50  ;;  %v1709_v35 = vmov 86  }
  0xec   : > { %vm343_vm1 = vmor %vm336_vm13, %vm341_vm15 }
  0xee   : > { %v346_v43 = vpop.permute.xlu1 %345 }
  0xef   : > { %vm347_vm2 = vcmp.eq.s32.totalorder %v346_v43, %v1869_v49  ;;  %vm348_vm3 = vcmp.eq.s32.totalorder %v346_v43, %v1871_v50  ;;  %v1713_v43 = vmov 90  }
  0xf0   : > { %vm349_vm5 = vmor %vm342_vm0, %vm347_vm2  ;;  %1437 = vset.pattern.permute.xlu1 %v1684_v44  ;;  %vm375_vm2 = vcmp.eq.s32.totalorder %v374_v52, %v1869_v49  ;;  %1474 = vset.pattern.permute.xlu0 %v1711_v40  ;;  %v1741_v40 = vmov 119  }
  0xf1   : > { %vm350_vm7 = vmor %vm343_vm1, %vm348_vm3  ;;  %569 = vperm.xlu1 %1437, %v1819_v3   ;;  %vm376_vm3 = vcmp.eq.s32.totalorder %v374_v52, %v1871_v50  ;;  %828 = vperm.xlu0 %1474, %v2054_v31   ;;  %v1716_v52 = vmov 103  }
  0xf2   : > { %vm356_vm8 = vmor %vm349_vm5, %vm354_vm4  ;;  %1438 = vset.pattern.permute.xlu2 %v1685_v45 }
  0xf3   : > { %vm357_vm9 = vmor %vm350_vm7, %vm355_vm6  ;;  %576 = vperm.xlu2 %1438, %v1819_v3   ;;  %v402_v46 = vpop.permute.xlu2 %401 }
  0xf7   : > { %v360_v47 = vpop.permute.xlu1 %359 }
  0xf8   : > { %vm361_vm10 = vcmp.eq.s32.totalorder %v360_v47, %v1869_v49  ;;  %vm362_vm11 = vcmp.eq.s32.totalorder %v360_v47, %v1871_v50  ;;  %v1715_v47 = vmov 92  }
  0xf9   : > { %vm363_vm13 = vmor %vm356_vm8, %vm361_vm10  ;;  %1440 = vset.pattern.permute.xlu1 %v1687_v51  ;;  %vm389_vm8 = vcmp.eq.s32.totalorder %v388_v42, %v1869_v49  ;;  %vm390_vm10 = vcmp.eq.s32.totalorder %v388_v42, %v1871_v50  ;;  %1479 = vset.pattern.permute.xlu0 %v1716_v52  ;;  %v1746_v52 = vmov 124  }
  0xfa   : > { %vm364_vm15 = vmor %vm357_vm9, %vm362_vm11  ;;  %590 = vperm.xlu1 %1440, %v1819_v3   ;;  %863 = vperm.xlu0 %1479, %v2054_v31  }
  0xfb   : > { %vm370_vm0 = vmor %vm363_vm13, %vm368_vm12  ;;  %1441 = vset.pattern.permute.xlu2 %v1688_v53  ;;  %v1717_v53 = vmov 94  }
  0xfc   : > { %vm371_vm1 = vmor %vm364_vm15, %vm369_vm14  ;;  %597 = vperm.xlu2 %1441, %v1819_v3   ;;  %v423_v54 = vpop.permute.xlu2 %422 }
  0xfd   : > { %vm377_vm4 = vmor %vm370_vm0, %vm375_vm2  ;;  %vm403_vm0 = vcmp.eq.s32.totalorder %v402_v46, %v1869_v49  ;;  %vm404_vm2 = vcmp.eq.s32.totalorder %v402_v46, %v1871_v50  ;;  %v1714_v46 = vmov 91  }
  0xfe   : > { %vm378_vm5 = vmor %vm371_vm1, %vm376_vm3 }
 0x100   : > { %v381_v55 = vpop.permute.xlu1 %380 }
 0x101   : > { %vm382_vm6 = vcmp.eq.s32.totalorder %v381_v55, %v1869_v49  ;;  %vm383_vm7 = vcmp.eq.s32.totalorder %v381_v55, %v1871_v50  ;;  %v1718_v55 = vmov 95  }
 0x102   : > { %vm384_vm9 = vmor %vm377_vm4, %vm382_vm6  ;;  %1442 = vset.pattern.permute.xlu1 %v1689_v56  ;;  %vm410_vm6 = vcmp.eq.s32.totalorder %v409_v62, %v1869_v49 }
 0x103   : > { %vm385_vm11 = vmor %vm378_vm5, %vm383_vm7  ;;  %604 = vperm.xlu1 %1442, %v1819_v3   ;;  %vm411_vm7 = vcmp.eq.s32.totalorder %v409_v62, %v1871_v50  ;;  %v1721_v62 = vmov 108  }
 0x104   : > { %vm391_vm12 = vmor %vm384_vm9, %vm389_vm8  ;;  %1443 = vset.pattern.permute.xlu2 %v1690_v57  ;;  %1484 = vset.pattern.permute.xlu0 %v1721_v62 }
 0x105   : > { %vm392_vm13 = vmor %vm385_vm11, %vm390_vm10  ;;  %611 = vperm.xlu2 %1443, %v1819_v3   ;;  %v437_v58 = vpop.permute.xlu2 %436  ;;  %898 = vperm.xlu0 %1484, %v2054_v31  }
 0x109   : > { %v395_v59 = vpop.permute.xlu1 %394 }
 0x10a   : > { %vm396_vm14 = vcmp.eq.s32.totalorder %v395_v59, %v1869_v49  ;;  %vm397_vm15 = vcmp.eq.s32.totalorder %v395_v59, %v1871_v50  ;;  %v1720_v59 = vmov 97  }
 0x10b   : > { %vm398_vm1 = vmor %vm391_vm12, %vm396_vm14  ;;  %1445 = vset.pattern.permute.xlu1 %v1692_v61  ;;  %vm424_vm12 = vcmp.eq.s32.totalorder %v423_v54, %v1869_v49  ;;  %vm425_vm14 = vcmp.eq.s32.totalorder %v423_v54, %v1871_v50 }
 0x10c   : > { %vm399_vm3 = vmor %vm392_vm13, %vm397_vm15  ;;  %625 = vperm.xlu1 %1445, %v1819_v3  }
 0x10d   : > { %vm405_vm4 = vmor %vm398_vm1, %vm403_vm0  ;;  %1446 = vset.pattern.permute.xlu2 %v1693_v63  ;;  %v1722_v63 = vmov 99  }
 0x10e   : > { %vm406_vm5 = vmor %vm399_vm3, %vm404_vm2  ;;  %632 = vperm.xlu2 %1446, %v1819_v3   ;;  %v458_v0 = vpop.permute.xlu2 %457 }
 0x10f   : > { %vm412_vm8 = vmor %vm405_vm4, %vm410_vm6  ;;  %vm438_vm4 = vcmp.eq.s32.totalorder %v437_v58, %v1869_v49  ;;  %vm439_vm6 = vcmp.eq.s32.totalorder %v437_v58, %v1871_v50  ;;  %v1719_v58 = vmov 96  }
 0x110   : > { %vm413_vm9 = vmor %vm406_vm5, %vm411_vm7 }
 0x112   : > { %v416_v2 = vpop.permute.xlu1 %415 }
 0x113   : > { %vm417_vm10 = vcmp.eq.s32.totalorder %v416_v2, %v1869_v49  ;;  %vm418_vm11 = vcmp.eq.s32.totalorder %v416_v2, %v1871_v50  ;;  %v1723_v2 = vmov 100  }
 0x114   : > { %vm419_vm13 = vmor %vm412_vm8, %vm417_vm10  ;;  %1447 = vset.pattern.permute.xlu1 %v1694_v4  ;;  %vm445_vm10 = vcmp.eq.s32.totalorder %v444_v10, %v1869_v49 }
 0x115   : > { %vm420_vm15 = vmor %vm413_vm9, %vm418_vm11  ;;  %639 = vperm.xlu1 %1447, %v1819_v3   ;;  %vm446_vm11 = vcmp.eq.s32.totalorder %v444_v10, %v1871_v50  ;;  %v1726_v10 = vmov 113  }
 0x116   : > { %vm426_vm0 = vmor %vm419_vm13, %vm424_vm12  ;;  %1448 = vset.pattern.permute.xlu2 %v1695_v5  ;;  %1489 = vset.pattern.permute.xlu0 %v1726_v10 }
 0x117   : > { %vm427_vm1 = vmor %vm420_vm15, %vm425_vm14  ;;  %646 = vperm.xlu2 %1448, %v1819_v3   ;;  %v472_v6 = vpop.permute.xlu2 %471  ;;  %933 = vperm.xlu0 %1489, %v2054_v31  }
 0x11b   : > { %v430_v7 = vpop.permute.xlu1 %429 }
 0x11c   : > { %vm431_vm2 = vcmp.eq.s32.totalorder %v430_v7, %v1869_v49  ;;  %vm432_vm3 = vcmp.eq.s32.totalorder %v430_v7, %v1871_v50  ;;  %v1725_v7 = vmov 102  }
 0x11d   : > { %vm433_vm5 = vmor %vm426_vm0, %vm431_vm2  ;;  %1450 = vset.pattern.permute.xlu1 %v1697_v9  ;;  %vm459_vm0 = vcmp.eq.s32.totalorder %v458_v0, %v1869_v49  ;;  %vm460_vm2 = vcmp.eq.s32.totalorder %v458_v0, %v1871_v50 }
 0x11e   : > { %vm434_vm7 = vmor %vm427_vm1, %vm432_vm3  ;;  %660 = vperm.xlu1 %1450, %v1819_v3  }
 0x11f   : > { %vm440_vm8 = vmor %vm433_vm5, %vm438_vm4  ;;  %1451 = vset.pattern.permute.xlu2 %v1698_v11  ;;  %v1727_v11 = vmov 104  }
 0x120   : > { %vm441_vm9 = vmor %vm434_vm7, %vm439_vm6  ;;  %667 = vperm.xlu2 %1451, %v1819_v3   ;;  %v493_v12 = vpop.permute.xlu2 %492 }
 0x121   : > { %vm447_vm12 = vmor %vm440_vm8, %vm445_vm10  ;;  %vm473_vm8 = vcmp.eq.s32.totalorder %v472_v6, %v1869_v49  ;;  %vm474_vm10 = vcmp.eq.s32.totalorder %v472_v6, %v1871_v50  ;;  %v1724_v6 = vmov 101  }
 0x122   : > { %vm448_vm13 = vmor %vm441_vm9, %vm446_vm11 }
 0x124   : > { %v451_v13 = vpop.permute.xlu1 %450 }
 0x125   : > { %vm452_vm14 = vcmp.eq.s32.totalorder %v451_v13, %v1869_v49  ;;  %vm453_vm15 = vcmp.eq.s32.totalorder %v451_v13, %v1871_v50  ;;  %v1728_v13 = vmov 105  }
 0x126   : > { %vm454_vm1 = vmor %vm447_vm12, %vm452_vm14  ;;  %1452 = vset.pattern.permute.xlu1 %v1699_v14  ;;  %vm480_vm14 = vcmp.eq.s32.totalorder %v479_v20, %v1869_v49 }
 0x127   : > { %vm455_vm3 = vmor %vm448_vm13, %vm453_vm15  ;;  %674 = vperm.xlu1 %1452, %v1819_v3   ;;  %vm481_vm15 = vcmp.eq.s32.totalorder %v479_v20, %v1871_v50  ;;  %v1731_v20 = vmov 118  }
 0x128   : > { %vm461_vm4 = vmor %vm454_vm1, %vm459_vm0  ;;  %1453 = vset.pattern.permute.xlu2 %v1700_v15  ;;  %1494 = vset.pattern.permute.xlu0 %v1731_v20 }
 0x129   : > { %vm462_vm5 = vmor %vm455_vm3, %vm460_vm2  ;;  %681 = vperm.xlu2 %1453, %v1819_v3   ;;  %v507_v16 = vpop.permute.xlu2 %506  ;;  %968 = vperm.xlu0 %1494, %v2054_v31  }
 0x12d   : > { %v465_v17 = vpop.permute.xlu1 %464 }
 0x12e   : > { %vm466_vm6 = vcmp.eq.s32.totalorder %v465_v17, %v1869_v49  ;;  %vm467_vm7 = vcmp.eq.s32.totalorder %v465_v17, %v1871_v50  ;;  %v1730_v17 = vmov 107  }
 0x12f   : > { %vm468_vm9 = vmor %vm461_vm4, %vm466_vm6  ;;  %1455 = vset.pattern.permute.xlu1 %v1702_v19  ;;  %vm494_vm4 = vcmp.eq.s32.totalorder %v493_v12, %v1869_v49  ;;  %vm495_vm6 = vcmp.eq.s32.totalorder %v493_v12, %v1871_v50 }
 0x130   : > { %vm469_vm11 = vmor %vm462_vm5, %vm467_vm7  ;;  %695 = vperm.xlu1 %1455, %v1819_v3  }
 0x131   : > { %vm475_vm12 = vmor %vm468_vm9, %vm473_vm8  ;;  %1456 = vset.pattern.permute.xlu2 %v1703_v21  ;;  %v1732_v21 = vmov 109  }
 0x132   : > { %vm476_vm13 = vmor %vm469_vm11, %vm474_vm10  ;;  %702 = vperm.xlu2 %1456, %v1819_v3   ;;  %v528_v22 = vpop.permute.xlu2 %527 }
 0x133   : > { %vm482_vm0 = vmor %vm475_vm12, %vm480_vm14  ;;  %vm508_vm12 = vcmp.eq.s32.totalorder %v507_v16, %v1869_v49  ;;  %vm509_vm14 = vcmp.eq.s32.totalorder %v507_v16, %v1871_v50  ;;  %v1729_v16 = vmov 106  }
 0x134   : > { %vm483_vm1 = vmor %vm476_vm13, %vm481_vm15 }
 0x136   : > { %v486_v23 = vpop.permute.xlu1 %485 }
 0x137   : > { %vm487_vm2 = vcmp.eq.s32.totalorder %v486_v23, %v1869_v49  ;;  %vm488_vm3 = vcmp.eq.s32.totalorder %v486_v23, %v1871_v50  ;;  %v1733_v23 = vmov 110  }
 0x138   : > { %vm489_vm5 = vmor %vm482_vm0, %vm487_vm2  ;;  %1457 = vset.pattern.permute.xlu1 %v1704_v24 }
 0x139   : > { %vm490_vm7 = vmor %vm483_vm1, %vm488_vm3  ;;  %709 = vperm.xlu1 %1457, %v1819_v3  }
 0x13a   : > { %vm496_vm8 = vmor %vm489_vm5, %vm494_vm4  ;;  %1458 = vset.pattern.permute.xlu2 %v1705_v25 }
 0x13b   : > { %vm2045_vm9 = vmor %vm490_vm7, %vm495_vm6  ;;  %716 = vperm.xlu2 %1458, %v1819_v3   ;;  %v542_v27 = vpop.permute.xlu2 %541  ;;  %v514_v3 = vpop.permute.xlu0 %513 }
 0x13c   : > { %vm515_vm2 = vcmp.eq.s32.totalorder %v514_v3, %v1869_v49  ;;  %vm516_vm3 = vcmp.eq.s32.totalorder %v514_v3, %v1871_v50  ;;  %v1737_v3 = vmov 114  }
 0x13f   : > { %v500_v28 = vpop.permute.xlu1 %499 }
 0x140   : > { %vm501_vm10 = vcmp.eq.s32.totalorder %v500_v28, %v1869_v49  ;;  %vm502_vm11 = vcmp.eq.s32.totalorder %v500_v28, %v1871_v50 }
 0x141   : > { %vm503_vm13 = vmor %vm496_vm8, %vm501_vm10  ;;  %1460 = vset.pattern.permute.xlu1 %v1707_v30  ;;  %vm529_vm8 = vcmp.eq.s32.totalorder %v528_v22, %v1869_v49  ;;  %vm530_vm10 = vcmp.eq.s32.totalorder %v528_v22, %v1871_v50  ;;  %v1736_v30 = vmov 123  }
 0x142   : > { %vm504_vm15 = vmor %vm2045_vm9, %vm502_vm11  ;;  %730 = vperm.xlu1 %1460, %v2054_v31   ;;  %1499 = vset.pattern.permute.xlu0 %v1736_v30 }
 0x143   : > { %vm510_vm0 = vmor %vm503_vm13, %vm508_vm12  ;;  %1461 = vset.pattern.permute.xlu2 %v1708_v32  ;;  %v549_v42 = vpop.permute.xlu0 %548  ;;  %1003 = vperm.xlu0 %1499, %v2054_v31  }
 0x144   : > { %vm511_vm1 = vmor %vm504_vm15, %vm509_vm14  ;;  %737 = vperm.xlu2 %1461, %v2054_v31   ;;  %v563_v33 = vpop.permute.xlu2 %562 }
 0x145   : > { %vm517_vm4 = vmor %vm510_vm0, %vm515_vm2  ;;  %vm543_vm0 = vcmp.eq.s32.totalorder %v542_v27, %v1869_v49  ;;  %vm544_vm2 = vcmp.eq.s32.totalorder %v542_v27, %v1871_v50  ;;  %v1735_v27 = vmov 112  }
 0x146   : > { %vm518_vm5 = vmor %vm511_vm1, %vm516_vm3 }
 0x148   : > { %v521_v34 = vpop.permute.xlu1 %520 }
 0x149   : > { %vm522_vm6 = vcmp.eq.s32.totalorder %v521_v34, %v1869_v49  ;;  %vm523_vm7 = vcmp.eq.s32.totalorder %v521_v34, %v1871_v50 }
 0x14a   : > { %vm524_vm9 = vmor %vm517_vm4, %vm522_vm6  ;;  %1462 = vset.pattern.permute.xlu1 %v1709_v35  ;;  %vm550_vm6 = vcmp.eq.s32.totalorder %v549_v42, %v1869_v49 }
 0x14b   : > { %vm525_vm11 = vmor %vm518_vm5, %vm523_vm7  ;;  %744 = vperm.xlu1 %1462, %v2054_v31   ;;  %vm551_vm7 = vcmp.eq.s32.totalorder %v549_v42, %v1871_v50  ;;  %v584_v54 = vpop.permute.xlu0 %583 }
 0x14c   : > { %vm531_vm12 = vmor %vm524_vm9, %vm529_vm8  ;;  %1463 = vset.pattern.permute.xlu2 %v1710_v36  ;;  %v1739_v36 = vmov 116  }
 0x14d   : > { %vm532_vm13 = vmor %vm525_vm11, %vm530_vm10  ;;  %751 = vperm.xlu2 %1463, %v2054_v31   ;;  %v577_v38 = vpop.permute.xlu2 %576 }
 0x151   : > { %v535_v39 = vpop.permute.xlu1 %534 }
 0x152   : > { %vm536_vm14 = vcmp.eq.s32.totalorder %v535_v39, %v1869_v49  ;;  %vm537_vm15 = vcmp.eq.s32.totalorder %v535_v39, %v1871_v50 }
 0x153   : > { %vm538_vm1 = vmor %vm531_vm12, %vm536_vm14  ;;  %1465 = vset.pattern.permute.xlu1 %v1712_v41  ;;  %vm564_vm12 = vcmp.eq.s32.totalorder %v563_v33, %v1869_v49  ;;  %vm565_vm14 = vcmp.eq.s32.totalorder %v563_v33, %v1871_v50  ;;  %v619_v0 = vpop.permute.xlu0 %618  ;;  %v1738_v33 = vmov 115  }
 0x154   : > { %vm539_vm3 = vmor %vm532_vm13, %vm537_vm15  ;;  %765 = vperm.xlu1 %1465, %v2054_v31  }
 0x155   : > { %vm545_vm4 = vmor %vm538_vm1, %vm543_vm0  ;;  %1466 = vset.pattern.permute.xlu2 %v1713_v43  ;;  %v1742_v43 = vmov 120  }
 0x156   : > { %vm546_vm5 = vmor %vm539_vm3, %vm544_vm2  ;;  %772 = vperm.xlu2 %1466, %v2054_v31   ;;  %v598_v44 = vpop.permute.xlu2 %597 }
 0x157   : > { %vm552_vm8 = vmor %vm545_vm4, %vm550_vm6  ;;  %vm578_vm4 = vcmp.eq.s32.totalorder %v577_v38, %v1869_v49  ;;  %vm579_vm6 = vcmp.eq.s32.totalorder %v577_v38, %v1871_v50  ;;  %v1740_v38 = vmov 117  }
 0x158   : > { %vm553_vm9 = vmor %vm546_vm5, %vm551_vm7 }
 0x15a   : > { %v556_v45 = vpop.permute.xlu1 %555 }
 0x15b   : > { %vm557_vm10 = vcmp.eq.s32.totalorder %v556_v45, %v1869_v49  ;;  %vm558_vm11 = vcmp.eq.s32.totalorder %v556_v45, %v1871_v50  ;;  %v654_v12 = vpop.permute.xlu0 %653  ;;  %v1743_v45 = vmov 121  }
 0x15c   : > { %vm559_vm13 = vmor %vm552_vm8, %vm557_vm10  ;;  %1467 = vset.pattern.permute.xlu1 %v1714_v46  ;;  %vm585_vm10 = vcmp.eq.s32.totalorder %v584_v54, %v1869_v49 }
 0x15d   : > { %vm560_vm15 = vmor %vm553_vm9, %vm558_vm11  ;;  %779 = vperm.xlu1 %1467, %v2054_v31   ;;  %vm586_vm11 = vcmp.eq.s32.totalorder %v584_v54, %v1871_v50 }
 0x15e   : > { %vm566_vm0 = vmor %vm559_vm13, %vm564_vm12  ;;  %1468 = vset.pattern.permute.xlu2 %v1715_v47  ;;  %v1744_v47 = vmov 122  }
 0x15f   : > { %vm567_vm1 = vmor %vm560_vm15, %vm565_vm14  ;;  %786 = vperm.xlu2 %1468, %v2054_v31   ;;  %v612_v48 = vpop.permute.xlu2 %611 }
 0x163   : > { %v570_v51 = vpop.permute.xlu1 %569  ;;  %v689_v22 = vpop.permute.xlu0 %688 }
 0x164   : > { %vm571_vm2 = vcmp.eq.s32.totalorder %v570_v51, %v1869_v49  ;;  %vm572_vm3 = vcmp.eq.s32.totalorder %v570_v51, %v1871_v50  ;;  %v1745_v51 = vmov 127  }
 0x165   : > { %vm573_vm5 = vmor %vm566_vm0, %vm571_vm2  ;;  %1470 = vset.pattern.permute.xlu1 %v1717_v53  ;;  %vm599_vm0 = vcmp.eq.s32.totalorder %v598_v44, %v1869_v49  ;;  %vm600_vm2 = vcmp.eq.s32.totalorder %v598_v44, %v1871_v50  ;;  %1504 = vset.pattern.permute.xlu0 %v1745_v51 }
 0x166   : > { %vm574_vm7 = vmor %vm567_vm1, %vm572_vm3  ;;  %800 = vperm.xlu1 %1470, %v2054_v31  }
 0x167   : > { %vm580_vm8 = vmor %vm573_vm5, %vm578_vm4  ;;  %1471 = vset.pattern.permute.xlu2 %v1718_v55  ;;  %v1747_v55 = vmov 125  }
 0x168   : > { %vm581_vm9 = vmor %vm574_vm7, %vm579_vm6  ;;  %807 = vperm.xlu2 %1471, %v2054_v31   ;;  %v633_v56 = vpop.permute.xlu2 %632 }
 0x169   : > { %vm587_vm12 = vmor %vm580_vm8, %vm585_vm10  ;;  %vm613_vm8 = vcmp.eq.s32.totalorder %v612_v48, %v1869_v49  ;;  %vm614_vm10 = vcmp.eq.s32.totalorder %v612_v48, %v1871_v50 }
 0x16a   : > { %vm588_vm13 = vmor %vm581_vm9, %vm586_vm11 }
 0x16b   : > { %v724_v32 = vpop.permute.xlu0 %723 }
 0x16c   : > { %v591_v57 = vpop.permute.xlu1 %590 }
 0x16d   : > { %vm592_vm14 = vcmp.eq.s32.totalorder %v591_v57, %v1869_v49  ;;  %vm593_vm15 = vcmp.eq.s32.totalorder %v591_v57, %v1871_v50  ;;  %v1748_v57 = vmov 126  }
 0x16e   : > { %vm594_vm1 = vmor %vm587_vm12, %vm592_vm14  ;;  %1472 = vset.pattern.permute.xlu1 %v1719_v58  ;;  %vm620_vm14 = vcmp.eq.s32.totalorder %v619_v0, %v1869_v49 }
 0x16f   : > { %vm595_vm3 = vmor %vm588_vm13, %vm593_vm15  ;;  %814 = vperm.xlu1 %1472, %v2054_v31   ;;  %vm621_vm15 = vcmp.eq.s32.totalorder %v619_v0, %v1871_v50 }
 0x170   : > { %vm601_vm4 = vmor %vm594_vm1, %vm599_vm0  ;;  %1473 = vset.pattern.permute.xlu2 %v1720_v59 }
 0x171   : > { %vm602_vm5 = vmor %vm595_vm3, %vm600_vm2  ;;  %821 = vperm.xlu2 %1473, %v2054_v31   ;;  %v647_v60 = vpop.permute.xlu2 %646 }
 0x173   : > { %v759_v42 = vpop.permute.xlu0 %758 }
 0x175   : > { %v605_v61 = vpop.permute.xlu1 %604 }
 0x176   : > { %vm606_vm6 = vcmp.eq.s32.totalorder %v605_v61, %v1869_v49  ;;  %vm607_vm7 = vcmp.eq.s32.totalorder %v605_v61, %v1871_v50 }
 0x177   : > { %vm608_vm9 = vmor %vm601_vm4, %vm606_vm6  ;;  %1475 = vset.pattern.permute.xlu1 %v1722_v63  ;;  %vm634_vm4 = vcmp.eq.s32.totalorder %v633_v56, %v1869_v49  ;;  %vm635_vm6 = vcmp.eq.s32.totalorder %v633_v56, %v1871_v50 }
 0x178   : > { %vm609_vm11 = vmor %vm602_vm5, %vm607_vm7  ;;  %835 = vperm.xlu1 %1475, %v2054_v31  }
 0x179   : > { %vm615_vm12 = vmor %vm608_vm9, %vm613_vm8  ;;  %1476 = vset.pattern.permute.xlu2 %v1723_v2 }
 0x17a   : > { %vm616_vm13 = vmor %vm609_vm11, %vm614_vm10  ;;  %842 = vperm.xlu2 %1476, %v2054_v31   ;;  %v668_v4 = vpop.permute.xlu2 %667 }
 0x17b   : > { %vm622_vm0 = vmor %vm615_vm12, %vm620_vm14  ;;  %vm648_vm12 = vcmp.eq.s32.totalorder %v647_v60, %v1869_v49  ;;  %vm649_vm14 = vcmp.eq.s32.totalorder %v647_v60, %v1871_v50  ;;  %v794_v53 = vpop.permute.xlu0 %793 }
 0x17c   : > { %vm623_vm1 = vmor %vm616_vm13, %vm621_vm15 }
 0x17e   : > { %v626_v5 = vpop.permute.xlu1 %625 }
 0x17f   : > { %vm627_vm2 = vcmp.eq.s32.totalorder %v626_v5, %v1869_v49  ;;  %vm628_vm3 = vcmp.eq.s32.totalorder %v626_v5, %v1871_v50 }
 0x180   : > { %vm629_vm5 = vmor %vm622_vm0, %vm627_vm2  ;;  %1477 = vset.pattern.permute.xlu1 %v1724_v6  ;;  %vm655_vm2 = vcmp.eq.s32.totalorder %v654_v12, %v1869_v49 }
 0x181   : > { %vm630_vm7 = vmor %vm623_vm1, %vm628_vm3  ;;  %849 = vperm.xlu1 %1477, %v2054_v31   ;;  %vm656_vm3 = vcmp.eq.s32.totalorder %v654_v12, %v1871_v50 }
 0x182   : > { %vm636_vm8 = vmor %vm629_vm5, %vm634_vm4  ;;  %1478 = vset.pattern.permute.xlu2 %v1725_v7 }
 0x183   : > { %vm637_vm9 = vmor %vm630_vm7, %vm635_vm6  ;;  %856 = vperm.xlu2 %1478, %v2054_v31   ;;  %v682_v8 = vpop.permute.xlu2 %681 }
 0x187   : > { %v640_v9 = vpop.permute.xlu1 %639 }
 0x188   : > { %vm641_vm10 = vcmp.eq.s32.totalorder %v640_v9, %v1869_v49  ;;  %vm642_vm11 = vcmp.eq.s32.totalorder %v640_v9, %v1871_v50 }
 0x189   : > { %vm643_vm13 = vmor %vm636_vm8, %vm641_vm10  ;;  %1480 = vset.pattern.permute.xlu1 %v1727_v11  ;;  %vm669_vm8 = vcmp.eq.s32.totalorder %v668_v4, %v1869_v49  ;;  %vm670_vm10 = vcmp.eq.s32.totalorder %v668_v4, %v1871_v50  ;;  %v829_v4 = vpop.permute.xlu0 %828 }
 0x18a   : > { %vm644_vm15 = vmor %vm637_vm9, %vm642_vm11  ;;  %870 = vperm.xlu1 %1480, %v2054_v31  }
 0x18b   : > { %vm650_vm0 = vmor %vm643_vm13, %vm648_vm12  ;;  %1481 = vset.pattern.permute.xlu2 %v1728_v13 }
 0x18c   : > { %vm651_vm1 = vmor %vm644_vm15, %vm649_vm14  ;;  %877 = vperm.xlu2 %1481, %v2054_v31   ;;  %v703_v14 = vpop.permute.xlu2 %702 }
 0x18d   : > { %vm657_vm4 = vmor %vm650_vm0, %vm655_vm2  ;;  %vm683_vm0 = vcmp.eq.s32.totalorder %v682_v8, %v1869_v49  ;;  %vm684_vm2 = vcmp.eq.s32.totalorder %v682_v8, %v1871_v50 }
 0x18e   : > { %vm658_vm5 = vmor %vm651_vm1, %vm656_vm3 }
 0x190   : > { %v661_v15 = vpop.permute.xlu1 %660 }
 0x191   : > { %vm662_vm6 = vcmp.eq.s32.totalorder %v661_v15, %v1869_v49  ;;  %vm663_vm7 = vcmp.eq.s32.totalorder %v661_v15, %v1871_v50  ;;  %v864_v7 = vpop.permute.xlu0 %863 }
 0x192   : > { %vm664_vm9 = vmor %vm657_vm4, %vm662_vm6  ;;  %1482 = vset.pattern.permute.xlu1 %v1729_v16  ;;  %vm690_vm6 = vcmp.eq.s32.totalorder %v689_v22, %v1869_v49 }
 0x193   : > { %vm665_vm11 = vmor %vm658_vm5, %vm663_vm7  ;;  %884 = vperm.xlu1 %1482, %v2054_v31   ;;  %vm691_vm7 = vcmp.eq.s32.totalorder %v689_v22, %v1871_v50 }
 0x194   : > { %vm671_vm12 = vmor %vm664_vm9, %vm669_vm8  ;;  %1483 = vset.pattern.permute.xlu2 %v1730_v17 }
 0x195   : > { %vm672_vm13 = vmor %vm665_vm11, %vm670_vm10  ;;  %891 = vperm.xlu2 %1483, %v2054_v31   ;;  %v717_v18 = vpop.permute.xlu2 %716 }
 0x199   : > { %v675_v19 = vpop.permute.xlu1 %674  ;;  %v899_v12 = vpop.permute.xlu0 %898 }
 0x19a   : > { %vm676_vm14 = vcmp.eq.s32.totalorder %v675_v19, %v1869_v49  ;;  %vm677_vm15 = vcmp.eq.s32.totalorder %v675_v19, %v1871_v50 }
 0x19b   : > { %vm678_vm1 = vmor %vm671_vm12, %vm676_vm14  ;;  %1485 = vset.pattern.permute.xlu1 %v1732_v21  ;;  %vm704_vm12 = vcmp.eq.s32.totalorder %v703_v14, %v1869_v49  ;;  %vm705_vm14 = vcmp.eq.s32.totalorder %v703_v14, %v1871_v50 }
 0x19c   : > { %vm679_vm3 = vmor %vm672_vm13, %vm677_vm15  ;;  %905 = vperm.xlu1 %1485, %v2054_v31  }
 0x19d   : > { %vm685_vm4 = vmor %vm678_vm1, %vm683_vm0  ;;  %1486 = vset.pattern.permute.xlu2 %v1733_v23 }
 0x19e   : > { %vm686_vm5 = vmor %vm679_vm3, %vm684_vm2  ;;  %912 = vperm.xlu2 %1486, %v2054_v31   ;;  %v738_v24 = vpop.permute.xlu2 %737 }
 0x19f   : > { %vm692_vm8 = vmor %vm685_vm4, %vm690_vm6  ;;  %vm718_vm4 = vcmp.eq.s32.totalorder %v717_v18, %v1869_v49  ;;  %vm719_vm6 = vcmp.eq.s32.totalorder %v717_v18, %v1871_v50 }
 0x1a0   : > { %vm693_vm9 = vmor %vm686_vm5, %vm691_vm7 }
 0x1a1   : > { %v934_v15 = vpop.permute.xlu0 %933 }
 0x1a2   : > { %v696_v25 = vpop.permute.xlu1 %695 }
 0x1a3   : > { %vm697_vm10 = vcmp.eq.s32.totalorder %v696_v25, %v1869_v49  ;;  %vm698_vm11 = vcmp.eq.s32.totalorder %v696_v25, %v1871_v50 }
 0x1a4   : > { %vm699_vm13 = vmor %vm692_vm8, %vm697_vm10  ;;  %1487 = vset.pattern.permute.xlu1 %v1734_v26  ;;  %vm725_vm10 = vcmp.eq.s32.totalorder %v724_v32, %v1869_v49 }
 0x1a5   : > { %vm700_vm15 = vmor %vm693_vm9, %vm698_vm11  ;;  %919 = vperm.xlu1 %1487, %v2054_v31   ;;  %vm726_vm11 = vcmp.eq.s32.totalorder %v724_v32, %v1871_v50 }
 0x1a6   : > { %vm706_vm0 = vmor %vm699_vm13, %vm704_vm12  ;;  %1488 = vset.pattern.permute.xlu2 %v1735_v27 }
 0x1a7   : > { %vm707_vm1 = vmor %vm700_vm15, %vm705_vm14  ;;  %926 = vperm.xlu2 %1488, %v2054_v31   ;;  %v752_v29 = vpop.permute.xlu2 %751 }
 0x1a9   : > { %v969_v19 = vpop.permute.xlu0 %968 }
 0x1ab   : > { %v710_v28 = vpop.permute.xlu1 %709 }
 0x1ac   : > { %vm711_vm2 = vcmp.eq.s32.totalorder %v710_v28, %v1869_v49  ;;  %vm712_vm3 = vcmp.eq.s32.totalorder %v710_v28, %v1871_v50  ;;  %v1037_v28 = vld [vmem:[#allocation2] sm:$0xf] }
 0x1ad   : > { %vm713_vm5 = vmor %vm706_vm0, %vm711_vm2  ;;  %1490 = vset.pattern.permute.xlu1 %v1737_v3  ;;  %vm739_vm0 = vcmp.eq.s32.totalorder %v738_v24, %v1869_v49  ;;  %vm740_vm2 = vcmp.eq.s32.totalorder %v738_v24, %v1871_v50 }
 0x1ae   : > { %vm714_vm7 = vmor %vm707_vm1, %vm712_vm3  ;;  %940 = vperm.xlu1 %1490, %v2054_v31  }
 0x1af   : > { %vm720_vm8 = vmor %vm713_vm5, %vm718_vm4  ;;  %1491 = vset.pattern.permute.xlu2 %v1738_v33 }
 0x1b0   : > { %vm721_vm9 = vmor %vm714_vm7, %vm719_vm6  ;;  %947 = vperm.xlu2 %1491, %v2054_v31   ;;  %v773_v35 = vpop.permute.xlu2 %772 }
 0x1b1   : > { %vm727_vm12 = vmor %vm720_vm8, %vm725_vm10  ;;  %vm753_vm8 = vcmp.eq.s32.totalorder %v752_v29, %v1869_v49  ;;  %vm754_vm10 = vcmp.eq.s32.totalorder %v752_v29, %v1871_v50 }
 0x1b2   : > { %vm728_vm13 = vmor %vm721_vm9, %vm726_vm11 }
 0x1b4   : > { %v731_v34 = vpop.permute.xlu1 %730 }
 0x1b5   : > { %vm732_vm14 = vcmp.eq.s32.totalorder %v731_v34, %v1869_v49  ;;  %vm733_vm15 = vcmp.eq.s32.totalorder %v731_v34, %v1871_v50  ;;  %v1004_v23 = vpop.permute.xlu0 %1003 }
 0x1b6   : > { %vm734_vm1 = vmor %vm727_vm12, %vm732_vm14  ;;  %1492 = vset.pattern.permute.xlu1 %v1739_v36  ;;  %vm760_vm14 = vcmp.eq.s32.totalorder %v759_v42, %v1869_v49 }
 0x1b7   : > { %vm735_vm3 = vmor %vm728_vm13, %vm733_vm15  ;;  %954 = vperm.xlu1 %1492, %v2054_v31   ;;  %vm761_vm15 = vcmp.eq.s32.totalorder %v759_v42, %v1871_v50 }
 0x1b8   : > { %vm741_vm4 = vmor %vm734_vm1, %vm739_vm0  ;;  %1493 = vset.pattern.permute.xlu2 %v1740_v38 }
 0x1b9   : > { %vm742_vm5 = vmor %vm735_vm3, %vm740_vm2  ;;  %961 = vperm.xlu2 %1493, %v2054_v31   ;;  %v787_v41 = vpop.permute.xlu2 %786 }
 0x1bd   : > { %v745_v39 = vpop.permute.xlu1 %744 }
 0x1be   : > { %vm746_vm6 = vcmp.eq.s32.totalorder %v745_v39, %v1869_v49  ;;  %vm747_vm7 = vcmp.eq.s32.totalorder %v745_v39, %v1871_v50 }
 0x1bf   : > { %vm748_vm9 = vmor %vm741_vm4, %vm746_vm6  ;;  %1495 = vset.pattern.permute.xlu1 %v1741_v40  ;;  %vm774_vm4 = vcmp.eq.s32.totalorder %v773_v35, %v1869_v49  ;;  %vm775_vm6 = vcmp.eq.s32.totalorder %v773_v35, %v1871_v50 }
 0x1c0   : > { %vm749_vm11 = vmor %vm742_vm5, %vm747_vm7  ;;  %975 = vperm.xlu1 %1495, %v2054_v31  }
 0x1c1   : > { %vm755_vm12 = vmor %vm748_vm9, %vm753_vm8  ;;  %1496 = vset.pattern.permute.xlu2 %v1742_v43 }
 0x1c2   : > { %vm756_vm13 = vmor %vm749_vm11, %vm754_vm10  ;;  %982 = vperm.xlu2 %1496, %v2054_v31   ;;  %v808_v46 = vpop.permute.xlu2 %807 }
 0x1c3   : > { %vm762_vm0 = vmor %vm755_vm12, %vm760_vm14  ;;  %vm788_vm12 = vcmp.eq.s32.totalorder %v787_v41, %v1869_v49  ;;  %vm789_vm14 = vcmp.eq.s32.totalorder %v787_v41, %v1871_v50 }
 0x1c4   : > { %vm763_vm1 = vmor %vm756_vm13, %vm761_vm15 }
 0x1c6   : > { %v766_v44 = vpop.permute.xlu1 %765 }
 0x1c7   : > { %vm767_vm2 = vcmp.eq.s32.totalorder %v766_v44, %v1869_v49  ;;  %vm768_vm3 = vcmp.eq.s32.totalorder %v766_v44, %v1871_v50 }
 0x1c8   : > { %vm769_vm5 = vmor %vm762_vm0, %vm767_vm2  ;;  %1497 = vset.pattern.permute.xlu1 %v1743_v45  ;;  %vm795_vm2 = vcmp.eq.s32.totalorder %v794_v53, %v1869_v49 }
 0x1c9   : > { %vm770_vm7 = vmor %vm763_vm1, %vm768_vm3  ;;  %989 = vperm.xlu1 %1497, %v2054_v31   ;;  %vm796_vm3 = vcmp.eq.s32.totalorder %v794_v53, %v1871_v50 }
 0x1ca   : > { %vm776_vm8 = vmor %vm769_vm5, %vm774_vm4  ;;  %1498 = vset.pattern.permute.xlu2 %v1744_v47 }
 0x1cb   : > { %vm777_vm9 = vmor %vm770_vm7, %vm775_vm6  ;;  %996 = vperm.xlu2 %1498, %v2054_v31   ;;  %v822_v54 = vpop.permute.xlu2 %821 }
 0x1cf   : > { %v780_v48 = vpop.permute.xlu1 %779 }
 0x1d0   : > { %vm781_vm10 = vcmp.eq.s32.totalorder %v780_v48, %v1869_v49  ;;  %vm782_vm11 = vcmp.eq.s32.totalorder %v780_v48, %v1871_v50 }
 0x1d1   : > { %vm783_vm13 = vmor %vm776_vm8, %vm781_vm10  ;;  %1500 = vset.pattern.permute.xlu1 %v1746_v52  ;;  %vm809_vm8 = vcmp.eq.s32.totalorder %v808_v46, %v1869_v49  ;;  %vm810_vm10 = vcmp.eq.s32.totalorder %v808_v46, %v1871_v50 }
 0x1d2   : > { %vm784_vm15 = vmor %vm777_vm9, %vm782_vm11  ;;  %1010 = vperm.xlu1 %1500, %v2054_v31  }
 0x1d3   : > { %vm790_vm0 = vmor %vm783_vm13, %vm788_vm12  ;;  %1501 = vset.pattern.permute.xlu2 %v1747_v55 }
 0x1d4   : > { %vm791_vm1 = vmor %vm784_vm15, %vm789_vm14  ;;  %1017 = vperm.xlu2 %1501, %v2054_v31   ;;  %v843_v58 = vpop.permute.xlu2 %842 }
 0x1d5   : > { %vm797_vm4 = vmor %vm790_vm0, %vm795_vm2  ;;  %vm823_vm0 = vcmp.eq.s32.totalorder %v822_v54, %v1869_v49  ;;  %vm824_vm2 = vcmp.eq.s32.totalorder %v822_v54, %v1871_v50 }
 0x1d6   : > { %vm798_vm5 = vmor %vm791_vm1, %vm796_vm3 }
 0x1d8   : > { %v801_v56 = vpop.permute.xlu1 %800 }
 0x1d9   : > { %vm802_vm6 = vcmp.eq.s32.totalorder %v801_v56, %v1869_v49  ;;  %vm803_vm7 = vcmp.eq.s32.totalorder %v801_v56, %v1871_v50 }
 0x1da   : > { %vm804_vm9 = vmor %vm797_vm4, %vm802_vm6  ;;  %1502 = vset.pattern.permute.xlu1 %v1748_v57  ;;  %vm830_vm6 = vcmp.eq.s32.totalorder %v829_v4, %v1869_v49 }
 0x1db   : > { %vm805_vm11 = vmor %vm798_vm5, %vm803_vm7  ;;  %1024 = vperm.xlu1 %1502, %v2054_v31   ;;  %vm831_vm7 = vcmp.eq.s32.totalorder %v829_v4, %v1871_v50 }
 0x1dc   : > { %vm811_vm12 = vmor %vm804_vm9, %vm809_vm8  ;;  %1503 = vset.pattern.permute.xlu2 %v1745_v51 }
 0x1dd   : > { %vm812_vm13 = vmor %vm805_vm11, %vm810_vm10  ;;  %1031 = vperm.xlu2 %1503, %v2054_v31   ;;  %v857_v61 = vpop.permute.xlu2 %856 }
 0x1e1   : > { %v815_v59 = vpop.permute.xlu1 %814 }
 0x1e2   : > { %vm816_vm14 = vcmp.eq.s32.totalorder %v815_v59, %v1869_v49  ;;  %vm817_vm15 = vcmp.eq.s32.totalorder %v815_v59, %v1871_v50 }
 0x1e3   : > { %vm818_vm1 = vmor %vm811_vm12, %vm816_vm14 }
 0x1e4   : > { %vm819_vm3 = vmor %vm812_vm13, %vm817_vm15  ;;  %vm844_vm13 = vcmp.eq.s32.totalorder %v843_v58, %v1869_v49  ;;  %vm845_vm15 = vcmp.eq.s32.totalorder %v843_v58, %v1871_v50 }
 0x1e5   : > { %vm825_vm4 = vmor %vm818_vm1, %vm823_vm0 }
 0x1e6   : > { %vm2191_vm5 = vmor %vm819_vm3, %vm824_vm2  ;;  %v878_v63 = vpop.permute.xlu2 %877 }
 0x1e7   : > { %vm832_vm9 = vmor %vm825_vm4, %vm830_vm6  ;;  %vm858_vm6 = vcmp.eq.s32.totalorder %v857_v61, %v1869_v49 }
 0x1e8   : > { %vm833_vm11 = vmor %vm2191_vm5, %vm831_vm7  ;;  %vm859_vm7 = vcmp.eq.s32.totalorder %v857_v61, %v1871_v50 }
 0x1ea   : > { %v836_v62 = vpop.permute.xlu1 %835 }
 0x1eb   : > { %vm837_vm8 = vcmp.eq.s32.totalorder %v836_v62, %v1869_v49  ;;  %vm838_vm10 = vcmp.eq.s32.totalorder %v836_v62, %v1871_v50 }
 0x1ec   : > { %vm839_vm12 = vmor %vm832_vm9, %vm837_vm8  ;;  %vm865_vm9 = vcmp.eq.s32.totalorder %v864_v7, %v1869_v49 }
 0x1ed   : > { %vm840_vm14 = vmor %vm833_vm11, %vm838_vm10  ;;  %vm866_vm11 = vcmp.eq.s32.totalorder %v864_v7, %v1871_v50 }
 0x1ee   : > { %vm846_vm1 = vmor %vm839_vm12, %vm844_vm13 }
 0x1ef   : > { %v892_v0 = vpop.permute.xlu2 %891  ;;  %vm847_vm3 = vmor %vm840_vm14, %vm845_vm15 }
 0x1f3   : > { %v850_v31 = vpop.permute.xlu1 %849 }
 0x1f4   : > { %vm851_vm0 = vcmp.eq.s32.totalorder %v850_v31, %v1869_v49  ;;  %vm852_vm2 = vcmp.eq.s32.totalorder %v850_v31, %v1871_v50 }
 0x1f5   : > { %vm853_vm4 = vmor %vm846_vm1, %vm851_vm0  ;;  %vm879_vm1 = vcmp.eq.s32.totalorder %v878_v63, %v1869_v49 }
 0x1f6   : > { %vm854_vm5 = vmor %vm847_vm3, %vm852_vm2  ;;  %vm880_vm3 = vcmp.eq.s32.totalorder %v878_v63, %v1871_v50 }
 0x1f7   : > { %vm860_vm8 = vmor %vm853_vm4, %vm858_vm6 }
 0x1f8   : > { %v913_v6 = vpop.permute.xlu2 %912  ;;  %vm861_vm10 = vmor %vm854_vm5, %vm859_vm7 }
 0x1f9   : > { %vm867_vm13 = vmor %vm860_vm8, %vm865_vm9  ;;  %vm893_vm9 = vcmp.eq.s32.totalorder %v892_v0, %v1869_v49 }
 0x1fa   : > { %vm868_vm15 = vmor %vm861_vm10, %vm866_vm11  ;;  %vm894_vm11 = vcmp.eq.s32.totalorder %v892_v0, %v1871_v50 }
 0x1fc   : > { %v871_v2 = vpop.permute.xlu1 %870 }
 0x1fd   : > { %vm872_vm12 = vcmp.eq.s32.totalorder %v871_v2, %v1869_v49  ;;  %vm873_vm14 = vcmp.eq.s32.totalorder %v871_v2, %v1871_v50 }
 0x1fe   : > { %vm874_vm0 = vmor %vm867_vm13, %vm872_vm12  ;;  %vm900_vm13 = vcmp.eq.s32.totalorder %v899_v12, %v1869_v49 }
 0x1ff   : > { %vm875_vm2 = vmor %vm868_vm15, %vm873_vm14  ;;  %vm901_vm15 = vcmp.eq.s32.totalorder %v899_v12, %v1871_v50 }
 0x200   : > { %vm881_vm6 = vmor %vm874_vm0, %vm879_vm1 }
 0x201   : > { %v927_v9 = vpop.permute.xlu2 %926  ;;  %vm882_vm7 = vmor %vm875_vm2, %vm880_vm3 }
 0x205   : > { %v885_v5 = vpop.permute.xlu1 %884 }
 0x206   : > { %vm886_vm4 = vcmp.eq.s32.totalorder %v885_v5, %v1869_v49  ;;  %vm887_vm5 = vcmp.eq.s32.totalorder %v885_v5, %v1871_v50 }
 0x207   : > { %vm888_vm8 = vmor %vm881_vm6, %vm886_vm4  ;;  %vm914_vm6 = vcmp.eq.s32.totalorder %v913_v6, %v1869_v49 }
 0x208   : > { %vm889_vm10 = vmor %vm882_vm7, %vm887_vm5  ;;  %vm915_vm7 = vcmp.eq.s32.totalorder %v913_v6, %v1871_v50 }
 0x209   : > { %vm895_vm12 = vmor %vm888_vm8, %vm893_vm9 }
 0x20a   : > { %v948_v11 = vpop.permute.xlu2 %947  ;;  %vm896_vm14 = vmor %vm889_vm10, %vm894_vm11 }
 0x20b   : > { %vm902_vm1 = vmor %vm895_vm12, %vm900_vm13  ;;  %vm928_vm13 = vcmp.eq.s32.totalorder %v927_v9, %v1869_v49 }
 0x20c   : > { %vm903_vm3 = vmor %vm896_vm14, %vm901_vm15  ;;  %vm929_vm15 = vcmp.eq.s32.totalorder %v927_v9, %v1871_v50 }
 0x20e   : > { %v906_v8 = vpop.permute.xlu1 %905 }
 0x20f   : > { %vm907_vm0 = vcmp.eq.s32.totalorder %v906_v8, %v1869_v49  ;;  %vm908_vm2 = vcmp.eq.s32.totalorder %v906_v8, %v1871_v50 }
 0x210   : > { %vm909_vm4 = vmor %vm902_vm1, %vm907_vm0  ;;  %vm935_vm1 = vcmp.eq.s32.totalorder %v934_v15, %v1869_v49 }
 0x211   : > { %vm910_vm5 = vmor %vm903_vm3, %vm908_vm2  ;;  %vm936_vm3 = vcmp.eq.s32.totalorder %v934_v15, %v1871_v50 }
 0x212   : > { %vm916_vm9 = vmor %vm909_vm4, %vm914_vm6 }
 0x213   : > { %v962_v14 = vpop.permute.xlu2 %961  ;;  %vm917_vm11 = vmor %vm910_vm5, %vm915_vm7 }
 0x217   : > { %v920_v10 = vpop.permute.xlu1 %919 }
 0x218   : > { %vm921_vm8 = vcmp.eq.s32.totalorder %v920_v10, %v1869_v49  ;;  %vm922_vm10 = vcmp.eq.s32.totalorder %v920_v10, %v1871_v50 }
 0x219   : > { %vm923_vm12 = vmor %vm916_vm9, %vm921_vm8  ;;  %vm949_vm9 = vcmp.eq.s32.totalorder %v948_v11, %v1869_v49 }
 0x21a   : > { %vm924_vm14 = vmor %vm917_vm11, %vm922_vm10  ;;  %vm950_vm11 = vcmp.eq.s32.totalorder %v948_v11, %v1871_v50 }
 0x21b   : > { %vm930_vm0 = vmor %vm923_vm12, %vm928_vm13 }
 0x21c   : > { %vm931_vm2 = vmor %vm924_vm14, %vm929_vm15  ;;  %v983_v17 = vpop.permute.xlu2 %982 }
 0x21d   : > { %vm937_vm6 = vmor %vm930_vm0, %vm935_vm1  ;;  %vm963_vm1 = vcmp.eq.s32.totalorder %v962_v14, %v1869_v49 }
 0x21e   : > { %vm938_vm7 = vmor %vm931_vm2, %vm936_vm3  ;;  %vm964_vm3 = vcmp.eq.s32.totalorder %v962_v14, %v1871_v50 }
 0x220   : > { %v941_v13 = vpop.permute.xlu1 %940 }
 0x221   : > { %vm942_vm4 = vcmp.eq.s32.totalorder %v941_v13, %v1869_v49  ;;  %vm943_vm5 = vcmp.eq.s32.totalorder %v941_v13, %v1871_v50 }
 0x222   : > { %vm944_vm8 = vmor %vm937_vm6, %vm942_vm4  ;;  %vm970_vm6 = vcmp.eq.s32.totalorder %v969_v19, %v1869_v49 }
 0x223   : > { %vm945_vm10 = vmor %vm938_vm7, %vm943_vm5  ;;  %vm971_vm7 = vcmp.eq.s32.totalorder %v969_v19, %v1871_v50 }
 0x224   : > { %vm951_vm13 = vmor %vm944_vm8, %vm949_vm9 }
 0x225   : > { %vm952_vm15 = vmor %vm945_vm10, %vm950_vm11  ;;  %v997_v20 = vpop.permute.xlu2 %996 }
 0x229   : > { %v955_v16 = vpop.permute.xlu1 %954 }
 0x22a   : > { %vm956_vm12 = vcmp.eq.s32.totalorder %v955_v16, %v1869_v49  ;;  %vm957_vm14 = vcmp.eq.s32.totalorder %v955_v16, %v1871_v50 }
 0x22b   : > { %vm958_vm0 = vmor %vm951_vm13, %vm956_vm12  ;;  %vm984_vm13 = vcmp.eq.s32.totalorder %v983_v17, %v1869_v49 }
 0x22c   : > { %vm959_vm2 = vmor %vm952_vm15, %vm957_vm14  ;;  %vm985_vm15 = vcmp.eq.s32.totalorder %v983_v17, %v1871_v50 }
 0x22d   : > { %vm965_vm4 = vmor %vm958_vm0, %vm963_vm1 }
 0x22e   : > { %vm966_vm5 = vmor %vm959_vm2, %vm964_vm3  ;;  %v1018_v22 = vpop.permute.xlu2 %1017 }
 0x22f   : > { %vm972_vm9 = vmor %vm965_vm4, %vm970_vm6  ;;  %vm998_vm6 = vcmp.eq.s32.totalorder %v997_v20, %v1869_v49 }
 0x230   : > { %vm973_vm11 = vmor %vm966_vm5, %vm971_vm7  ;;  %vm999_vm7 = vcmp.eq.s32.totalorder %v997_v20, %v1871_v50 }
 0x232   : > { %v976_v18 = vpop.permute.xlu1 %975 }
 0x233   : > { %vm977_vm8 = vcmp.eq.s32.totalorder %v976_v18, %v1869_v49  ;;  %vm978_vm10 = vcmp.eq.s32.totalorder %v976_v18, %v1871_v50 }
 0x234   : > { %vm979_vm12 = vmor %vm972_vm9, %vm977_vm8  ;;  %vm1005_vm9 = vcmp.eq.s32.totalorder %v1004_v23, %v1869_v49 }
 0x235   : > { %vm980_vm14 = vmor %vm973_vm11, %vm978_vm10  ;;  %vm1006_vm11 = vcmp.eq.s32.totalorder %v1004_v23, %v1871_v50 }
 0x236   : > { %vm986_vm1 = vmor %vm979_vm12, %vm984_vm13 }
 0x237   : > { %vm987_vm3 = vmor %vm980_vm14, %vm985_vm15  ;;  %v1032_v25 = vpop.permute.xlu2 %1031 }
 0x23b   : > { %v990_v21 = vpop.permute.xlu1 %989 }
 0x23c   : > { %vm991_vm0 = vcmp.eq.s32.totalorder %v990_v21, %v1869_v49  ;;  %vm992_vm2 = vcmp.eq.s32.totalorder %v990_v21, %v1871_v50 }
 0x23d   : > { %vm993_vm4 = vmor %vm986_vm1, %vm991_vm0  ;;  %vm1019_vm1 = vcmp.eq.s32.totalorder %v1018_v22, %v1869_v49 }
 0x23e   : > { %vm994_vm5 = vmor %vm987_vm3, %vm992_vm2  ;;  %vm1020_vm3 = vcmp.eq.s32.totalorder %v1018_v22, %v1871_v50 }
 0x23f   : > { %vm1000_vm8 = vmor %vm993_vm4, %vm998_vm6 }
 0x240   : > { %vm1001_vm10 = vmor %vm994_vm5, %vm999_vm7 }
 0x241   : > { %vm1007_vm13 = vmor %vm1000_vm8, %vm1005_vm9  ;;  %vm1033_vm8 = vcmp.eq.s32.totalorder %v1032_v25, %v1869_v49 }
 0x242   : > { %vm1008_vm15 = vmor %vm1001_vm10, %vm1006_vm11  ;;  %vm1034_vm10 = vcmp.eq.s32.totalorder %v1032_v25, %v1871_v50 }
 0x244   : > { %v1011_v24 = vpop.permute.xlu1 %1010 }
 0x245   : > { %vm1012_vm12 = vcmp.eq.s32.totalorder %v1011_v24, %v1869_v49  ;;  %vm1013_vm14 = vcmp.eq.s32.totalorder %v1011_v24, %v1871_v50 }
 0x246   : > { %vm1014_vm0 = vmor %vm1007_vm13, %vm1012_vm12 }
 0x247   : > { %vm1015_vm2 = vmor %vm1008_vm15, %vm1013_vm14  ;;  %vm1041_vm14 = vcmask 1041408  }
 0x248   : > { %vm1021_vm4 = vmor %vm1014_vm0, %vm1019_vm1 }
 0x249   : > { %vm1022_vm6 = vmor %vm1015_vm2, %vm1020_vm3 }
 0x24d   : > { %v1025_v26 = vpop.permute.xlu1 %1024 }
 0x24e   : > { %vm1026_vm5 = vcmp.eq.s32.totalorder %v1025_v26, %v1869_v49  ;;  %vm1027_vm7 = vcmp.eq.s32.totalorder %v1025_v26, %v1871_v50 }
 0x24f   : > { %vm1028_vm9 = vmor %vm1021_vm4, %vm1026_vm5  ;;  %vm1082_vm5 = vcmp.lt.s32.totalorder %v137_v37, 256 }
 0x250   : > { %vm1029_vm11 = vmor %vm1022_vm6, %vm1027_vm7  ;;  %vm1077_vm6 = vcmask 1040384  }
 0x251   : > { %vm1035_vm12 = vmor %vm1028_vm9, %vm1033_vm8 }
 0x252   : > { %vm1036_vm13 = vmor %vm1029_vm11, %vm1034_vm10  ;;  %v1038_v30 = vsel %vm1035_vm12, 1, %v1622_v1 }
 0x253   : > { %v1039_v27 = vsel %vm1036_vm13, 1, %v1622_v1 }
 0x254   : > { %v1040_v29 = vrot.slane %v1039_v27, 6 }
 0x256   : > { %v1042_v3 = vsel %vm1041_vm14, %v1038_v30, %v1040_v29 }
 0x257   : > { %v1043_v32 = vor.u32 %v1042_v3, %v1037_v28 }
 0x259   : > { %1044 = vst [vmem:[#allocation2] sm:$0xf] %v1043_v32 }
 0x260   : > { %v1048_v33 = vld [vmem:[#allocation2] sm:$0xf] }
 0x261   : > { %1049 = vst [vmem:[#allocation1] ss:$4 sm:$0xff] %v1048_v33 }
 0x268   : > { %v1050_v49 = vld.sshfl [vmem:[#allocation1] sm:$0xff pattern:$0x73625140]  ;;  %v1051_v34 = vld.sshfl [vmem:[#allocation1 + $0x8] sm:$0xff pattern:$0x73625140] }
 0x269   : > { %v1052_v50 = vsel %vm1041_vm14, %v1050_v49, 2147483648  ;;  %v1062_v35 = vsel %vm1041_vm14, %v1051_v34, 2147483648 }
 0x26a   : > { %v1053_v36 = vrot.slane %v1052_v50, 4  ;;  %v1063_v38 = vrot.slane %v1062_v35, 4 }
 0x26c   : > { %vm1054_vm15 = vcmp.gt.s32.totalorder %v1052_v50, %v1053_v36  ;;  %vm1064_vm0 = vcmp.gt.s32.totalorder %v1062_v35, %v1063_v38 }
 0x26d   : > { %v1055_v39 = vsel %vm1054_vm15, %v1052_v50, %v1053_v36  ;;  %v1065_v40 = vsel %vm1064_vm0, %v1062_v35, %v1063_v38 }
 0x26e   : > { %v1056_v41 = vrot.slane %v1055_v39, 2  ;;  %v1066_v1 = vrot.slane %v1065_v40, 2 }
 0x270   : > { %vm1057_vm1 = vcmp.gt.s32.totalorder %v1055_v39, %v1056_v41  ;;  %vm1067_vm2 = vcmp.gt.s32.totalorder %v1065_v40, %v1066_v1 }
 0x271   : > { %v1058_v42 = vsel %vm1057_vm1, %v1055_v39, %v1056_v41  ;;  %v1068_v43 = vsel %vm1067_vm2, %v1065_v40, %v1066_v1 }
 0x272   : > { %v1059_v44 = vrot.slane %v1058_v42, 1  ;;  %v1069_v45 = vrot.slane %v1068_v43, 1 }
 0x274   : > { %vm1060_vm3 = vcmp.gt.s32.totalorder %v1058_v42, %v1059_v44  ;;  %vm1070_vm4 = vcmp.gt.s32.totalorder %v1068_v43, %v1069_v45 }
 0x275   : > { %v1061_v46 = vsel %vm1060_vm3, %v1058_v42, %v1059_v44  ;;  %v1071_v47 = vsel %vm1070_vm4, %v1068_v43, %v1069_v45 }
 0x276   : > { %v1073_v48 = vcvt.s32.f32 %v1071_v47  ;;  %v1072_v51 = vcvt.s32.f32 %v1061_v46 }
 0x278   : > { %v1076_v52 = vrot.slane %v1073_v48, 7 }
 0x27a   : > { %v1078_v53 = vsel %vm1077_vm6, %v1072_v51, %v1076_v52 }
 0x27b   : > { %1084 = vst.msk [vmem:[%s128_s3] sm:$0x3] %vm1082_vm5, %v1078_v53 }
 0x27c   : > { %1563 = shalt.err (!%p1560_p7)
}
 0x27d   : > { %1186 = dma.vmem_to_hbm [thread:$0]  (%p1799_p4), %s1099_s4, 32, %s1101_s5, %s1086_s9  }
 0x27e PF: > { %p1198_p9 = scmp.ge.s32.totalorder %s1618_s11, 2  ;;  %s1112_s23 = sand.u32 1, %s1598_s6  }
 0x27f   : > { %s1113_s24 = scalar_lea.sflag [#allocation5], %s1112_s23 }
 0x280   : > { %p1193_p10 = pnand %p1198_p9, %p1806_p8 }
 0x282   : > { %p1194_p11 = pneg %p1193_p10 }
 0x284   : > { %1593 = dma.done.wait (%p1194_p11), %s1113_s24, 32  }
 0x285   : > { %1595 = vsyncadd (%p1194_p11), %s1113_s24, 4294967264  ;;  %s15_s11 = sadd.s32 1, %s1618_s11   ;;  %s2309_s6 = smov %s1602_s7 }
 0x286   : > { %p12_p12 = scmp.ge.s32.totalorder %s15_s11, 4   ;;  %s2310_s7 = smov %s1606_s8 }
 0x287   : > { %s2311_s8 = smov %s1812_s19  ;;  %s2312_s9 = smov %s1614_s10 }
 0x288   : > { %s2313_s10 = smov %s2315_s14  ;;  %14 = sbr.rel (!%p12_p12) target bundleno = 5 (0x5), region = 70 }
 0x28d   :  { %1119 = vsyncpa [#allocation4], 1 }
 0x28e   :  { %1121 = vsyncpa [#allocation4 + $0x1], 1 }
 0x28f   :  { %1122 = vsyncpa [#allocation5], 1 }
 0x290   :  { %1124 = vsyncpa [#allocation5 + $0x1], 1 }

</bundles_post_ra>
